<compile_context>
chip_gen: v6e
topology: v6e:2x2x1
jax: 0.10.0
libtpu: 0.0.40
codegen_flags: <defaults>
</compile_context>

<pallas_src>
import jax
import jax.numpy as jnp
from jax.experimental import pallas as pl
from jax.experimental.pallas import tpu as pltpu

EPS = 1e-5


# --------------------------- offline weight prep -------------------------------

def _toeplitz_weight(w, w_in, w_out):
    """PyTorch conv weight w: (Co, Ci, 2, 2) -> (2, w_in*Ci, w_out*Co) block-Toeplitz
    matrices, one per vertical tap ky, so that a row-shifted 2-D matmul implements
    the 2x2 cross-correlation:
        out[ky][x_in*Ci + c, x_out*Co + co] = w[co, c, ky, x_in - x_out]  (taps 0/1)."""
    co_n, ci_n, kh, kw = w.shape
    d = jnp.arange(w_in)[:, None] - jnp.arange(w_out)[None, :]          # (w_in, w_out)
    valid = ((d >= 0) & (d < kw)).astype(w.dtype)
    dc = jnp.clip(d, 0, kw - 1)
    wt = jnp.transpose(w, (2, 3, 1, 0))                                 # (kh, kw, Ci, Co)
    blocks = wt[:, dc] * valid[None, :, :, None, None]                  # (kh, w_in, w_out, Ci, Co)
    blocks = jnp.transpose(blocks, (0, 1, 3, 2, 4))                     # (kh, w_in, Ci, w_out, Co)
    return blocks.reshape(kh, w_in * ci_n, w_out * co_n)


def _group_matrices(w_out, ch, width_pad):
    """Indicator matrices for per-channel reduce / broadcast over (x, c) columns.
    Zero rows/cols cover the lane padding so BN stats only count real elements."""
    g = jnp.tile(jnp.eye(ch, dtype=jnp.float32), (w_out, 1))            # (w_out*ch, ch)
    g = jnp.pad(g, ((0, width_pad - w_out * ch), (0, 0)))               # (width_pad, ch)
    return g, g.T


def prepare_params(params, h, w):
    """One-time weight preprocessing (would be folded offline in deployment)."""
    w1, b1, w2, b2, wh, bh = params     # b1, b2 unused: exactly canceled by BN mean subtraction
    c_in = w1.shape[1]
    c1, c2 = w1.shape[0], w2.shape[0]
    w1out, w2out = w + 1, w             # conv1: k=2, pad=1 ; conv2: k=2, pad=0
    h2 = h
    out_dim = wh.shape[0]

    K1_PAD = 128                        # conv1 K (two taps, 2*40=80) padded to one K tile
    N1_PAD = 256                        # lane-dense conv1 slab width (144 -> 256)

    # conv1: tap-concatenated block-Toeplitz, K 80 -> 128, N 144 -> 256 (zero pad).
    w1t = _toeplitz_weight(w1, w + 2, w1out)                  # (2, 40, 144)
    w1cat = jnp.concatenate([w1t[0], w1t[1]], axis=0)         # (80, 144)
    w1cat = jnp.pad(w1cat, ((0, K1_PAD - w1cat.shape[0]),
                            (0, N1_PAD - w1out * c1)))        # (128, 256)

    # conv2: per-tap K padded to N1_PAD (rows line up with y1's padded columns),
    # taps concatenated along K -> (512, 256); output width 8*32 = 256 (already dense).
    w2t = _toeplitz_weight(w2, w1out, w2out)                  # (2, 144, 256)
    w2t = jnp.pad(w2t, ((0, 0), (0, N1_PAD - w2t.shape[1]), (0, 0)))
    w2cat = jnp.concatenate([w2t[0], w2t[1]], axis=0)         # (512, 256)

    # BN indicator matrices (padded columns contribute zero and are not counted).
    g1, g1t = _group_matrices(w1out, c1, N1_PAD)
    g2, g2t = _group_matrices(w2out, c2, w2out * c2)

    # Head weight: wh[o, c*h2*w2 + y*w2 + x] -> whp[y*(w2*c2) + x*c2 + c, o]
    # (pre-flattened so the head is one (n, 2048) x (2048, out) matmul).
    whp = jnp.transpose(wh.reshape(out_dim, c2, h2, w2out),
                        (2, 3, 1, 0)).reshape(h2 * w2out * c2, out_dim)
    return (w1cat, g1, g1t, w2cat, g2, g2t, whp, bh.reshape(1, -1))


# ------------------------------ fused Pallas kernel ----------------------------

def _make_fused_kernel(bsz, h1, h2, w1out, w2out):
    r1 = bsz * h1          # rows of the conv1 output slab (= N * H1out)
    r2 = bsz * h2          # rows of the conv2 output slab (= N * H2out)
    f32 = jnp.float32

    def bn_relu(z, g, gt, n_per_channel):
        # z: (rows, width_pad). Training-mode BN (biased var, identity affine) + ReLU.
        # One-pass sufficient statistics: sum(z) and sum(z*z) in the same slab pass,
        # channel-group reduce/broadcast via tiny indicator matmuls, rsqrt on the EUP,
        # then a single fused (z - mean)*scale + ReLU pass (no centered temporary).
        inv_m = 1.0 / float(n_per_channel)
        s1 = jnp.sum(z, axis=0, keepdims=True)                                     # (1, Wp)
        s2 = jnp.sum(z * z, axis=0, keepdims=True)                                 # (1, Wp)
        mean_c = jnp.dot(s1, g, preferred_element_type=f32) * inv_m                # (1, C)
        ex2_c = jnp.dot(s2, g, preferred_element_type=f32) * inv_m                 # (1, C)
        scale_c = jax.lax.rsqrt(ex2_c - mean_c * mean_c + EPS)                     # (1, C)
        mean_b = jnp.dot(mean_c, gt, preferred_element_type=f32)                   # (1, Wp)
        scale_b = jnp.dot(scale_c, gt, preferred_element_type=f32)                 # (1, Wp)
        return jnp.maximum((z - mean_b) * scale_b, 0.0)

    def kernel(a0_ref, w1k_ref, g1_ref, g1t_ref, w2k_ref, g2_ref, g2t_ref,
               whp_ref, bh_ref, o_ref, y1_ref, y2_ref):
        # ---- conv1 (2x2, stride 1, pad 1): ONE tap-concatenated block-Toeplitz matmul.
        #      (conv bias omitted: exactly canceled by the BN mean subtraction)
        z1 = jnp.dot(a0_ref[...], w1k_ref[...], preferred_element_type=f32)        # (r1, 256)
        y1_ref[...] = bn_relu(z1, g1_ref[...], g1t_ref[...], r1 * w1out)           # lane-dense store

        # ---- conv2 (2x2, stride 1, pad 0): lane-concat the two row-shifted taps of the
        #      VMEM-resident y1 slab (tile-aligned), then ONE matmul with K = 512.
        lhs2 = jnp.concatenate([y1_ref[0:r2, :], y1_ref[bsz:bsz + r2, :]], axis=1)  # (r2, 512)
        z2 = jnp.dot(lhs2, w2k_ref[...], preferred_element_type=f32)                # (r2, 256)
        y2_ref[...] = bn_relu(z2, g2_ref[...], g2t_ref[...], r2 * w2out)

        # ---- Linear head: rearrange (y, n) row order to (n, y*x*c) by a lane-tile-
        #      aligned concat of the h2 row blocks, then ONE long-K matmul.
        lhs_h = jnp.concatenate(
            [y2_ref[hh * bsz:(hh + 1) * bsz, :] for hh in range(h2)], axis=1)       # (bsz, 2048)
        o_ref[...] = (jnp.dot(lhs_h, whp_ref[...], preferred_element_type=f32)
                      + bh_ref[...])

    return kernel


@jax.jit
def conv_model_forward(x, prepped):
    """x: (N, C_in, H, W) float32 (PyTorch NCHW)."""
    w1cat, g1, g1t, w2cat, g2, g2t, whp, bh2d = prepped
    n, c, h, w = x.shape
    h1, h2 = h + 1, h
    w1out, w2out = w + 1, w
    out_dim = bh2d.shape[1]
    r1 = n * h1

    # Tiny boundary layout prep on the raw input only (~1.6 KB):
    # NCHW -> zero-padded 2-D slab with rows (y, n) and cols (x, c); the two ky taps
    # are pre-concatenated along lanes and zero-padded to a single 128-lane K tile.
    a0 = jnp.pad(jnp.transpose(x, (2, 0, 3, 1)), ((1, 1), (0, 0), (1, 1), (0, 0)))
    a0 = a0.reshape((h + 2) * n, (w + 2) * c)
    a0cat = jnp.concatenate([a0[0:r1, :], a0[n:n + r1, :]], axis=1)      # (r1, 80)
    a0cat = jnp.pad(a0cat, ((0, 0), (0, w1cat.shape[0] - a0cat.shape[1])))  # (r1, 128)

    kernel = _make_fused_kernel(n, h1, h2, w1out, w2out)
    vmem = pl.BlockSpec(memory_space=pltpu.MemorySpace.VMEM)
    return pl.pallas_call(
        kernel,
        out_shape=jax.ShapeDtypeStruct((n, out_dim), jnp.float32),
        in_specs=[vmem] * 9,
        out_specs=vmem,
        scratch_shapes=[
            pltpu.VMEM((r1, w1cat.shape[1]), jnp.float32),      # conv1 slab (lane-dense 256)
            pltpu.VMEM((n * h2, w2cat.shape[1]), jnp.float32),  # conv2 slab (256)
        ],
    )(a0cat, w1cat, g1, g1t, w2cat, g2, g2t, whp, bh2d)


# ------------------------------ reference (JAX) --------------------------------

def reference_forward(x, params):
    w1, b1, w2, b2, wh, bh = params

    def conv(x, w, b, pad):
        y = jax.lax.conv_general_dilated(
            x, w, window_strides=(1, 1),
            padding=[(pad, pad), (pad, pad)],
            dimension_numbers=("NCHW", "OIHW", "NCHW"),
        )
        return y + b[None, :, None, None]

    def bn_relu(y):
        mean = y.mean(axis=(0, 2, 3), keepdims=True)
        var = ((y - mean) ** 2).mean(axis=(0, 2, 3), keepdims=True)
        return jnp.maximum((y - mean) * jax.lax.rsqrt(var + EPS), 0.0)

    y = bn_relu(conv(x, w1, b1, pad=1))
    y = bn_relu(conv(y, w2, b2, pad=0))
    return y.reshape(y.shape[0], -1) @ wh.T + bh


# ---------------------------------- main ----------------------------------------

if __name__ == "__main__":
    # Shapes consistent with ConvModel(in_channels=4, h=8, w=8, out_size=10)
    N, C_in, H, W, OUT = 2, 4, 8, 8, 10

    key = jax.random.PRNGKey(0)
    kx, k1, k2, k3, k4, k5, k6 = jax.random.split(key, 7)

    x = jax.random.normal(kx, (N, C_in, H, W), dtype=jnp.float32)

    # Deterministic parameter init (same shapes as the PyTorch module's params).
    w1 = 0.1 * jax.random.normal(k1, (16, C_in, 2, 2), dtype=jnp.float32)
    b1 = 0.1 * jax.random.normal(k2, (16,), dtype=jnp.float32)
    w2 = 0.1 * jax.random.normal(k3, (32, 16, 2, 2), dtype=jnp.float32)
    b2 = 0.1 * jax.random.normal(k4, (32,), dtype=jnp.float32)
    lin_in = 32 * H * W                                   # conv math: H2=H, W2=W here
    wh = 0.05 * jax.random.normal(k5, (OUT, lin_in), dtype=jnp.float32)
    bh = 0.05 * jax.random.normal(k6, (OUT,), dtype=jnp.float32)
    params = (w1, b1, w2, b2, wh, bh)

    prepped = prepare_params(params, H, W)

    out = jax.block_until_ready(conv_model_forward(x, prepped))
    ref = jax.block_until_ready(reference_forward(x, params))

    assert out.shape == (N, OUT), out.shape
    assert jnp.allclose(out, ref, atol=1e-2, rtol=1e-2), (
        f"max abs err {jnp.abs(out - ref).max()}"
    )
    print("KERNEL_OK")
</pallas_src>

<mosaic_0001>
module attributes {stable_mosaic.version = 11 : i64} {
  func.func @kernel(%arg0: memref<18x128xf32, #tpu.memory_space<vmem>>, %arg1: memref<128x256xf32, #tpu.memory_space<vmem>>, %arg2: memref<256x16xf32, #tpu.memory_space<vmem>>, %arg3: memref<16x256xf32, #tpu.memory_space<vmem>>, %arg4: memref<512x256xf32, #tpu.memory_space<vmem>>, %arg5: memref<256x32xf32, #tpu.memory_space<vmem>>, %arg6: memref<32x256xf32, #tpu.memory_space<vmem>>, %arg7: memref<2048x10xf32, #tpu.memory_space<vmem>>, %arg8: memref<1x10xf32, #tpu.memory_space<vmem>>, %arg9: memref<2x10xf32, #tpu.memory_space<vmem>>, %arg10: memref<18x256xf32, #tpu.memory_space<vmem>>, %arg11: memref<16x256xf32, #tpu.memory_space<vmem>>) attributes {dimension_semantics = [], scalar_prefetch = 0 : i64, scratch_operands = 2 : i64, tpu.core_type = #tpu.core_type<tc>} {
    %c0 = arith.constant 0 : index
    %c0_0 = arith.constant 0 : index
    %0 = vector.load %arg0[%c0, %c0_0] : memref<18x128xf32, #tpu.memory_space<vmem>>, vector<18x128xf32>
    %c0_1 = arith.constant 0 : index
    %c0_2 = arith.constant 0 : index
    %1 = vector.load %arg1[%c0_1, %c0_2] : memref<128x256xf32, #tpu.memory_space<vmem>>, vector<128x256xf32>
    %cst = arith.constant dense<0.000000e+00> : vector<18x256xf32>
    %2 = tpu.matmul %0, %1, %cst {dimension_numbers = #tpu.dot_dimension_numbers<[1], [0], [0], [1], [0, 0, 1, 1], [], []>} : vector<18x128xf32>, vector<128x256xf32>, vector<18x256xf32> -> vector<18x256xf32>
    %c0_3 = arith.constant 0 : index
    %c0_4 = arith.constant 0 : index
    %3 = vector.load %arg2[%c0_3, %c0_4] : memref<256x16xf32, #tpu.memory_space<vmem>>, vector<256x16xf32>
    %c0_5 = arith.constant 0 : index
    %c0_6 = arith.constant 0 : index
    %4 = vector.load %arg3[%c0_5, %c0_6] : memref<16x256xf32, #tpu.memory_space<vmem>>, vector<16x256xf32>
    %cst_7 = arith.constant dense<0.000000e+00> : vector<256xf32>
    %5 = vector.multi_reduction <add>, %2, %cst_7 [0] : vector<18x256xf32> to vector<256xf32>
    %6 = vector.shape_cast %5 : vector<256xf32> to vector<1x256xf32>
    %7 = arith.mulf %2, %2 : vector<18x256xf32>
    %cst_8 = arith.constant dense<0.000000e+00> : vector<256xf32>
    %8 = vector.multi_reduction <add>, %7, %cst_8 [0] : vector<18x256xf32> to vector<256xf32>
    %9 = vector.shape_cast %8 : vector<256xf32> to vector<1x256xf32>
    %cst_9 = arith.constant dense<0.000000e+00> : vector<1x16xf32>
    %10 = tpu.matmul %6, %3, %cst_9 {dimension_numbers = #tpu.dot_dimension_numbers<[1], [0], [0], [1], [0, 0, 1, 1], [], []>} : vector<1x256xf32>, vector<256x16xf32>, vector<1x16xf32> -> vector<1x16xf32>
    %cst_10 = arith.constant 0.00617283955 : f32
    %11 = vector.broadcast %cst_10 : f32 to vector<1x16xf32>
    %12 = arith.mulf %10, %11 : vector<1x16xf32>
    %cst_11 = arith.constant dense<0.000000e+00> : vector<1x16xf32>
    %13 = tpu.matmul %9, %3, %cst_11 {dimension_numbers = #tpu.dot_dimension_numbers<[1], [0], [0], [1], [0, 0, 1, 1], [], []>} : vector<1x256xf32>, vector<256x16xf32>, vector<1x16xf32> -> vector<1x16xf32>
    %cst_12 = arith.constant 0.00617283955 : f32
    %14 = vector.broadcast %cst_12 : f32 to vector<1x16xf32>
    %15 = arith.mulf %13, %14 : vector<1x16xf32>
    %16 = arith.mulf %12, %12 : vector<1x16xf32>
    %17 = arith.subf %15, %16 : vector<1x16xf32>
    %cst_13 = arith.constant 9.99999974E-6 : f32
    %18 = vector.broadcast %cst_13 : f32 to vector<1x16xf32>
    %19 = arith.addf %17, %18 : vector<1x16xf32>
    %20 = math.rsqrt %19 : vector<1x16xf32>
    %cst_14 = arith.constant dense<0.000000e+00> : vector<1x256xf32>
    %21 = tpu.matmul %12, %4, %cst_14 {dimension_numbers = #tpu.dot_dimension_numbers<[1], [0], [0], [1], [0, 0, 1, 1], [], []>} : vector<1x16xf32>, vector<16x256xf32>, vector<1x256xf32> -> vector<1x256xf32>
    %cst_15 = arith.constant dense<0.000000e+00> : vector<1x256xf32>
    %22 = tpu.matmul %20, %4, %cst_15 {dimension_numbers = #tpu.dot_dimension_numbers<[1], [0], [0], [1], [0, 0, 1, 1], [], []>} : vector<1x16xf32>, vector<16x256xf32>, vector<1x256xf32> -> vector<1x256xf32>
    %23 = vector.broadcast %21 : vector<1x256xf32> to vector<18x256xf32>
    %24 = arith.subf %2, %23 : vector<18x256xf32>
    %25 = vector.broadcast %22 : vector<1x256xf32> to vector<18x256xf32>
    %26 = arith.mulf %24, %25 : vector<18x256xf32>
    %cst_16 = arith.constant 0.000000e+00 : f32
    %27 = vector.broadcast %cst_16 : f32 to vector<18x256xf32>
    %28 = arith.maximumf %26, %27 : vector<18x256xf32>
    %c0_17 = arith.constant 0 : index
    %c0_18 = arith.constant 0 : index
    %29 = vector.load %arg10[%c0_17, %c0_18] : memref<18x256xf32, #tpu.memory_space<vmem>>, vector<18x256xf32>
    tpu.vector_store %arg10[%c0_17, %c0_18], %28 {strides = array<i32>} : memref<18x256xf32, #tpu.memory_space<vmem>>, vector<18x256xf32>,
    %c0_19 = arith.constant 0 : index
    %c0_20 = arith.constant 0 : index
    %30 = vector.load %arg10[%c0_19, %c0_20] : memref<18x256xf32, #tpu.memory_space<vmem>>, vector<16x256xf32>
    %c2 = arith.constant 2 : index
    %c0_21 = arith.constant 0 : index
    %31 = vector.load %arg10[%c2, %c0_21] : memref<18x256xf32, #tpu.memory_space<vmem>>, vector<16x256xf32>
    %32 = tpu.concatenate %30, %31 in 1 : vector<16x256xf32>, vector<16x256xf32> -> vector<16x512xf32>
    %c0_22 = arith.constant 0 : index
    %c0_23 = arith.constant 0 : index
    %33 = vector.load %arg4[%c0_22, %c0_23] : memref<512x256xf32, #tpu.memory_space<vmem>>, vector<512x256xf32>
    %cst_24 = arith.constant dense<0.000000e+00> : vector<16x256xf32>
    %34 = tpu.matmul %32, %33, %cst_24 {dimension_numbers = #tpu.dot_dimension_numbers<[1], [0], [0], [1], [0, 0, 1, 1], [], []>} : vector<16x512xf32>, vector<512x256xf32>, vector<16x256xf32> -> vector<16x256xf32>
    %c0_25 = arith.constant 0 : index
    %c0_26 = arith.constant 0 : index
    %35 = vector.load %arg5[%c0_25, %c0_26] : memref<256x32xf32, #tpu.memory_space<vmem>>, vector<256x32xf32>
    %c0_27 = arith.constant 0 : index
    %c0_28 = arith.constant 0 : index
    %36 = vector.load %arg6[%c0_27, %c0_28] : memref<32x256xf32, #tpu.memory_space<vmem>>, vector<32x256xf32>
    %cst_29 = arith.constant dense<0.000000e+00> : vector<256xf32>
    %37 = vector.multi_reduction <add>, %34, %cst_29 [0] : vector<16x256xf32> to vector<256xf32>
    %38 = vector.shape_cast %37 : vector<256xf32> to vector<1x256xf32>
    %39 = arith.mulf %34, %34 : vector<16x256xf32>
    %cst_30 = arith.constant dense<0.000000e+00> : vector<256xf32>
    %40 = vector.multi_reduction <add>, %39, %cst_30 [0] : vector<16x256xf32> to vector<256xf32>
    %41 = vector.shape_cast %40 : vector<256xf32> to vector<1x256xf32>
    %cst_31 = arith.constant dense<0.000000e+00> : vector<1x32xf32>
    %42 = tpu.matmul %38, %35, %cst_31 {dimension_numbers = #tpu.dot_dimension_numbers<[1], [0], [0], [1], [0, 0, 1, 1], [], []>} : vector<1x256xf32>, vector<256x32xf32>, vector<1x32xf32> -> vector<1x32xf32>
    %cst_32 = arith.constant 7.812500e-03 : f32
    %43 = vector.broadcast %cst_32 : f32 to vector<1x32xf32>
    %44 = arith.mulf %42, %43 : vector<1x32xf32>
    %cst_33 = arith.constant dense<0.000000e+00> : vector<1x32xf32>
    %45 = tpu.matmul %41, %35, %cst_33 {dimension_numbers = #tpu.dot_dimension_numbers<[1], [0], [0], [1], [0, 0, 1, 1], [], []>} : vector<1x256xf32>, vector<256x32xf32>, vector<1x32xf32> -> vector<1x32xf32>
    %cst_34 = arith.constant 7.812500e-03 : f32
    %46 = vector.broadcast %cst_34 : f32 to vector<1x32xf32>
    %47 = arith.mulf %45, %46 : vector<1x32xf32>
    %48 = arith.mulf %44, %44 : vector<1x32xf32>
    %49 = arith.subf %47, %48 : vector<1x32xf32>
    %cst_35 = arith.constant 9.99999974E-6 : f32
    %50 = vector.broadcast %cst_35 : f32 to vector<1x32xf32>
    %51 = arith.addf %49, %50 : vector<1x32xf32>
    %52 = math.rsqrt %51 : vector<1x32xf32>
    %cst_36 = arith.constant dense<0.000000e+00> : vector<1x256xf32>
    %53 = tpu.matmul %44, %36, %cst_36 {dimension_numbers = #tpu.dot_dimension_numbers<[1], [0], [0], [1], [0, 0, 1, 1], [], []>} : vector<1x32xf32>, vector<32x256xf32>, vector<1x256xf32> -> vector<1x256xf32>
    %cst_37 = arith.constant dense<0.000000e+00> : vector<1x256xf32>
    %54 = tpu.matmul %52, %36, %cst_37 {dimension_numbers = #tpu.dot_dimension_numbers<[1], [0], [0], [1], [0, 0, 1, 1], [], []>} : vector<1x32xf32>, vector<32x256xf32>, vector<1x256xf32> -> vector<1x256xf32>
    %55 = vector.broadcast %53 : vector<1x256xf32> to vector<16x256xf32>
    %56 = arith.subf %34, %55 : vector<16x256xf32>
    %57 = vector.broadcast %54 : vector<1x256xf32> to vector<16x256xf32>
    %58 = arith.mulf %56, %57 : vector<16x256xf32>
    %cst_38 = arith.constant 0.000000e+00 : f32
    %59 = vector.broadcast %cst_38 : f32 to vector<16x256xf32>
    %60 = arith.maximumf %58, %59 : vector<16x256xf32>
    %c0_39 = arith.constant 0 : index
    %c0_40 = arith.constant 0 : index
    %61 = vector.load %arg11[%c0_39, %c0_40] : memref<16x256xf32, #tpu.memory_space<vmem>>, vector<16x256xf32>
    tpu.vector_store %arg11[%c0_39, %c0_40], %60 {strides = array<i32>} : memref<16x256xf32, #tpu.memory_space<vmem>>, vector<16x256xf32>,
    %c0_41 = arith.constant 0 : index
    %c0_42 = arith.constant 0 : index
    %62 = vector.load %arg11[%c0_41, %c0_42] : memref<16x256xf32, #tpu.memory_space<vmem>>, vector<2x256xf32>
    %c2_43 = arith.constant 2 : index
    %c0_44 = arith.constant 0 : index
    %63 = vector.load %arg11[%c2_43, %c0_44] : memref<16x256xf32, #tpu.memory_space<vmem>>, vector<2x256xf32>
    %c4 = arith.constant 4 : index
    %c0_45 = arith.constant 0 : index
    %64 = vector.load %arg11[%c4, %c0_45] : memref<16x256xf32, #tpu.memory_space<vmem>>, vector<2x256xf32>
    %c6 = arith.constant 6 : index
    %c0_46 = arith.constant 0 : index
    %65 = vector.load %arg11[%c6, %c0_46] : memref<16x256xf32, #tpu.memory_space<vmem>>, vector<2x256xf32>
    %c8 = arith.constant 8 : index
    %c0_47 = arith.constant 0 : index
    %66 = vector.load %arg11[%c8, %c0_47] : memref<16x256xf32, #tpu.memory_space<vmem>>, vector<2x256xf32>
    %c10 = arith.constant 10 : index
    %c0_48 = arith.constant 0 : index
    %67 = vector.load %arg11[%c10, %c0_48] : memref<16x256xf32, #tpu.memory_space<vmem>>, vector<2x256xf32>
    %c12 = arith.constant 12 : index
    %c0_49 = arith.constant 0 : index
    %68 = vector.load %arg11[%c12, %c0_49] : memref<16x256xf32, #tpu.memory_space<vmem>>, vector<2x256xf32>
    %c14 = arith.constant 14 : index
    %c0_50 = arith.constant 0 : index
    %69 = vector.load %arg11[%c14, %c0_50] : memref<16x256xf32, #tpu.memory_space<vmem>>, vector<2x256xf32>
    %70 = tpu.concatenate %62, %63, %64, %65, %66, %67, %68, %69 in 1 : vector<2x256xf32>, vector<2x256xf32>, vector<2x256xf32>, vector<2x256xf32>, vector<2x256xf32>, vector<2x256xf32>, vector<2x256xf32>, vector<2x256xf32> -> vector<2x2048xf32>
    %c0_51 = arith.constant 0 : index
    %c0_52 = arith.constant 0 : index
    %71 = vector.load %arg7[%c0_51, %c0_52] : memref<2048x10xf32, #tpu.memory_space<vmem>>, vector<2048x10xf32>
    %cst_53 = arith.constant dense<0.000000e+00> : vector<2x10xf32>
    %72 = tpu.matmul %70, %71, %cst_53 {dimension_numbers = #tpu.dot_dimension_numbers<[1], [0], [0], [1], [0, 0, 1, 1], [], []>} : vector<2x2048xf32>, vector<2048x10xf32>, vector<2x10xf32> -> vector<2x10xf32>
    %c0_54 = arith.constant 0 : index
    %c0_55 = arith.constant 0 : index
    %73 = vector.load %arg8[%c0_54, %c0_55] : memref<1x10xf32, #tpu.memory_space<vmem>>, vector<1x10xf32>
    %74 = vector.broadcast %73 : vector<1x10xf32> to vector<2x10xf32>
    %75 = arith.addf %72, %74 : vector<2x10xf32>
    %c0_56 = arith.constant 0 : index
    %c0_57 = arith.constant 0 : index
    %76 = vector.load %arg9[%c0_56, %c0_57] : memref<2x10xf32, #tpu.memory_space<vmem>>, vector<2x10xf32>
    tpu.vector_store %arg9[%c0_56, %c0_57], %75 {strides = array<i32>} : memref<2x10xf32, #tpu.memory_space<vmem>>, vector<2x10xf32>,
    return
  }
}

</mosaic_0001>

<bundles_post_ra>
// kernel: conv_model_forward.1
= control target key start
LH: loop header
LB: loop body
LE: loop exit
PB: predicated region body
PF: predicated region fallthrough
CT: control target
= control target key end

     0   :  { %v2619_v4 = vmov 0.0   ;;  %s4267_s0 = inlined_call_operand.vmem [shape: f32[18,128], index: 0, kind: input, shape index: {}]   ;;  %s4268_s1 = inlined_call_operand.vmem [shape: f32[128,256], index: 1, kind: input, shape index: {}]   ;;  %s4269_s2 = inlined_call_operand.vmem [shape: f32[256,16], index: 2, kind: input, shape index: {}]   ;;  %s4270_s3 = inlined_call_operand.vmem [shape: f32[16,256], index: 3, kind: input, shape index: {}]   ;;  %s4271_s4 = inlined_call_operand.vmem [shape: f32[512,256], index: 4, kind: input, shape index: {}]   ;;  %s4272_s5 = inlined_call_operand.vmem [shape: f32[256,32], index: 5, kind: input, shape index: {}]   ;;  %s4273_s6 = inlined_call_operand.vmem [shape: f32[32,256], index: 6, kind: input, shape index: {}]   ;;  %s4274_s7 = inlined_call_operand.vmem [shape: f32[2048,10], index: 7, kind: input, shape index: {}]   ;;  %s4275_s8 = inlined_call_operand.vmem [shape: f32[1,10], index: 8, kind: input, shape index: {}]   ;;  %s4276_s9 = inlined_call_operand.hbm [shape: f32[2,10], index: 9, kind: output, shape index: {}]  }
   0x1   :  { %v67_v0 = vld [vmem:[%s4268_s1 + $0xf8] sm:$0xff]  ;;  %v66_v1 = vld [vmem:[%s4268_s1 + $0xf0] sm:$0xff]  ;;  %v65_v2 = vld [vmem:[%s4268_s1 + $0xe8] sm:$0xff]  ;;  %132 = vmatprep.mubr.f32.mxu0 %v2619_v4 }
   0x2   :  { %68 = vmatprep.subr.mxu0 %v67_v0  ;;  %v64_v3 = vld [vmem:[%s4268_s1 + $0xe0] sm:$0xff]  ;;  %v63_v5 = vld [vmem:[%s4268_s1 + $0xd8] sm:$0xff]  ;;  %v62_v6 = vld [vmem:[%s4268_s1 + $0xd0] sm:$0xff] }
   0x3   :  { %69 = vmatpush1.msra.mxu0 %v66_v1  ;;  %v61_v7 = vld [vmem:[%s4268_s1 + $0xc8] sm:$0xff]  ;;  %v60_v8 = vld [vmem:[%s4268_s1 + $0xc0] sm:$0xff]  ;;  %v59_v9 = vld [vmem:[%s4268_s1 + $0xb8] sm:$0xff] }
   0x4   :  { %70 = vmatprep.subr.mxu0 %v65_v2  ;;  %v58_v10 = vld [vmem:[%s4268_s1 + $0xb0] sm:$0xff]  ;;  %v57_v11 = vld [vmem:[%s4268_s1 + $0xa8] sm:$0xff]  ;;  %v56_v12 = vld [vmem:[%s4268_s1 + $0xa0] sm:$0xff] }
   0x5   :  { %71 = vmatpush1.msra.mxu0 %v64_v3  ;;  %v55_v13 = vld [vmem:[%s4268_s1 + $0x98] sm:$0xff]  ;;  %v54_v14 = vld [vmem:[%s4268_s1 + $0x90] sm:$0xff]  ;;  %v53_v15 = vld [vmem:[%s4268_s1 + $0x88] sm:$0xff] }
   0x6   :  { %72 = vmatprep.subr.mxu0 %v63_v5  ;;  %v182_v16 = vld [vmem:[%s4269_s2 + $0xf8] sm:$0xff]  ;;  %v181_v18 = vld [vmem:[%s4269_s2 + $0xf0] sm:$0xff]  ;;  %v52_v20 = vld [vmem:[%s4268_s1 + $0x80] sm:$0xff] }
   0x7   :  { %73 = vmatpush1.msra.mxu0 %v62_v6  ;;  %2171 = vmatprep.subr.mxu1 %v182_v16  ;;  %v166_v17 = vld [vmem:[%s4269_s2 + $0x78] sm:$0xff]  ;;  %v165_v19 = vld [vmem:[%s4269_s2 + $0x70] sm:$0xff]  ;;  %v180_v21 = vld [vmem:[%s4269_s2 + $0xe8] sm:$0xff] }
   0x8   :  { %74 = vmatprep.subr.mxu0 %v61_v7  ;;  %2172 = vmatpush3.msra.mxu1 %v166_v17 }
   0x9   :  { %75 = vmatpush1.msra.mxu0 %v60_v8 }
   0xa   :  { %76 = vmatprep.subr.mxu0 %v59_v9 }
   0xb   :  { %77 = vmatpush1.msra.mxu0 %v58_v10 }
   0xc   :  { %78 = vmatprep.subr.mxu0 %v57_v11 }
   0xd   :  { %79 = vmatpush1.msra.mxu0 %v56_v12 }
   0xe   :  { %80 = vmatprep.subr.mxu0 %v55_v13 }
   0xf   :  { %14 = vsyncpa [#allocation5], 0  ;;  %81 = vmatpush1.msra.mxu0 %v54_v14  ;;  %v51_v22 = vld [vmem:[%s4268_s1 + $0x78] sm:$0xff]  ;;  %2173 = vmatprep.subr.mxu1 %v181_v18  ;;  %v50_v23 = vld [vmem:[%s4268_s1 + $0x70] sm:$0xff]  ;;  %vm188_vm0 = vcmask 1041408   ;;  %vm376_vm1 = vcmask 130048  }
  0x10   :  { %82 = vmatprep.subr.mxu0 %v53_v15  ;;  %2174 = vmatpush3.msra.mxu1 %v165_v19  ;;  %v49_v24 = vld [vmem:[%s4268_s1 + $0x68] sm:$0xff]  ;;  %v48_v25 = vld [vmem:[%s4268_s1 + $0x60] sm:$0xff]  ;;  %v47_v26 = vld [vmem:[%s4268_s1 + $0x58] sm:$0xff]  ;;  %vm579_vm2 = vcmask 1045504   ;;  %vm1094_vm3 = vcmask 261120   ;;  %vm2150_vm4 = vcmask 74752  }
  0x11   :  { %83 = vmatpush1.msra.mxu0 %v52_v20  ;;  %2175 = vmatprep.subr.mxu1 %v180_v21  ;;  %v46_v27 = vld [vmem:[%s4268_s1 + $0x50] sm:$0xff]  ;;  %v45_v28 = vld [vmem:[%s4268_s1 + $0x48] sm:$0xff]  ;;  %v44_v29 = vld [vmem:[%s4268_s1 + $0x40] sm:$0xff] }
  0x12   :  { %84 = vmatprep.subr.mxu0 %v51_v22  ;;  %v43_v30 = vld [vmem:[%s4268_s1 + $0x38] sm:$0xff]  ;;  %v42_v31 = vld [vmem:[%s4268_s1 + $0x30] sm:$0xff]  ;;  %v41_v32 = vld [vmem:[%s4268_s1 + $0x28] sm:$0xff] }
  0x13   :  { %85 = vmatpush1.msra.mxu0 %v50_v23  ;;  %v40_v33 = vld [vmem:[%s4268_s1 + $0x20] sm:$0xff]  ;;  %v39_v34 = vld [vmem:[%s4268_s1 + $0x18] sm:$0xff]  ;;  %v38_v35 = vld [vmem:[%s4268_s1 + $0x10] sm:$0xff] }
  0x14   :  { %86 = vmatprep.subr.mxu0 %v49_v24  ;;  %v37_v36 = vld [vmem:[%s4268_s1 + $0x8] sm:$0xff]  ;;  %v36_v37 = vld [vmem:[%s4268_s1] sm:$0xff]  ;;  %v35_v40 = vld [vmem:[%s4267_s0 + $0x10] sm:$0x3] }
  0x15   :  { %87 = vmatpush1.msra.mxu0 %v48_v25  ;;  %v33_v38 = vld [vmem:[%s4267_s0] sm:$0xff]  ;;  %v34_v39 = vld [vmem:[%s4267_s0 + $0x8] sm:$0xff]  ;;  %v178_v44 = vld [vmem:[%s4269_s2 + $0xd8] sm:$0xff] }
  0x16   :  { %88 = vmatprep.subr.mxu0 %v47_v26  ;;  %v164_v41 = vld [vmem:[%s4269_s2 + $0x68] sm:$0xff]  ;;  %v179_v42 = vld [vmem:[%s4269_s2 + $0xe0] sm:$0xff]  ;;  %v162_v45 = vld [vmem:[%s4269_s2 + $0x58] sm:$0xff] }
  0x17   :  { %89 = vmatpush1.msra.mxu0 %v46_v27  ;;  %2176 = vmatpush3.msra.mxu1 %v164_v41  ;;  %v163_v43 = vld [vmem:[%s4269_s2 + $0x60] sm:$0xff]  ;;  %v177_v46 = vld [vmem:[%s4269_s2 + $0xd0] sm:$0xff]  ;;  %v176_v48 = vld [vmem:[%s4269_s2 + $0xc8] sm:$0xff] }
  0x18   :  { %90 = vmatprep.subr.mxu0 %v45_v28  ;;  %2177 = vmatprep.subr.mxu1 %v179_v42  ;;  %v161_v47 = vld [vmem:[%s4269_s2 + $0x50] sm:$0xff]  ;;  %v160_v49 = vld [vmem:[%s4269_s2 + $0x48] sm:$0xff]  ;;  %v175_v50 = vld [vmem:[%s4269_s2 + $0xc0] sm:$0xff] }
  0x19   :  { %91 = vmatpush1.msra.mxu0 %v44_v29  ;;  %2178 = vmatpush3.msra.mxu1 %v163_v43  ;;  %v159_v51 = vld [vmem:[%s4269_s2 + $0x40] sm:$0xff]  ;;  %v174_v52 = vld [vmem:[%s4269_s2 + $0xb8] sm:$0xff]  ;;  %v173_v54 = vld [vmem:[%s4269_s2 + $0xb0] sm:$0xff] }
  0x1a   :  { %92 = vmatprep.subr.mxu0 %v43_v30  ;;  %2179 = vmatprep.subr.mxu1 %v178_v44  ;;  %v158_v53 = vld [vmem:[%s4269_s2 + $0x38] sm:$0xff]  ;;  %v157_v55 = vld [vmem:[%s4269_s2 + $0x30] sm:$0xff]  ;;  %v172_v56 = vld [vmem:[%s4269_s2 + $0xa8] sm:$0xff] }
  0x1b   :  { %93 = vmatpush1.msra.mxu0 %v42_v31  ;;  %2180 = vmatpush3.msra.mxu1 %v162_v45  ;;  %v156_v57 = vld [vmem:[%s4269_s2 + $0x28] sm:$0xff]  ;;  %v171_v58 = vld [vmem:[%s4269_s2 + $0xa0] sm:$0xff]  ;;  %v170_v60 = vld [vmem:[%s4269_s2 + $0x98] sm:$0xff] }
  0x1c   :  { %94 = vmatprep.subr.mxu0 %v41_v32  ;;  %2181 = vmatprep.subr.mxu1 %v177_v46  ;;  %v155_v59 = vld [vmem:[%s4269_s2 + $0x20] sm:$0xff]  ;;  %v154_v61 = vld [vmem:[%s4269_s2 + $0x18] sm:$0xff]  ;;  %v169_v62 = vld [vmem:[%s4269_s2 + $0x90] sm:$0xff] }
  0x1d   :  { %95 = vmatpush1.msra.mxu0 %v40_v33  ;;  %2182 = vmatpush3.msra.mxu1 %v161_v47  ;;  %v153_v63 = vld [vmem:[%s4269_s2 + $0x10] sm:$0xff]  ;;  %v168_v0 = vld [vmem:[%s4269_s2 + $0x88] sm:$0xff]  ;;  %v167_v2 = vld [vmem:[%s4269_s2 + $0x80] sm:$0xff] }
  0x1e   :  { %96 = vmatprep.subr.mxu0 %v39_v34  ;;  %2183 = vmatprep.subr.mxu1 %v176_v48  ;;  %v152_v1 = vld [vmem:[%s4269_s2 + $0x8] sm:$0xff]  ;;  %v151_v3 = vld [vmem:[%s4269_s2] sm:$0xff] }
  0x1f   :  { %97 = vmatpush1.msra.mxu0 %v38_v35  ;;  %2184 = vmatpush3.msra.mxu1 %v160_v49 }
  0x20   :  { %98 = vmatprep.subr.mxu0 %v37_v36  ;;  %2185 = vmatprep.subr.mxu1 %v175_v50 }
  0x21   :  { %99 = vmatpush1.msra.mxu0 %v36_v37  ;;  %2186 = vmatpush3.msra.mxu1 %v159_v51 }
  0x22   :  { %133 = vmatmul.mubr.f32.vlgmr.msra.gmra.mxu0 %v33_v38  ;;  %2206 = vmatprep.subr.mxu0 %v182_v16 }
  0x23   :  { %138 = vmatprep.mubr.f32.mxu0 %v2619_v4  ;;  %2207 = vmatpush3.msra.mxu0 %v166_v17 }
  0x24   :  { %2208 = vmatprep.subr.mxu0 %v181_v18  ;;  %2187 = vmatprep.subr.mxu1 %v174_v52 }
  0x25   :  { %2209 = vmatpush3.msra.mxu0 %v165_v19  ;;  %2188 = vmatpush3.msra.mxu1 %v158_v53 }
  0x26   :  { %139 = vmatmul.mubr.f32.gmra.mxu0 %v34_v39  ;;  %2210 = vmatprep.subr.mxu0 %v180_v21 }
  0x27   :  { %144 = vmatprep.mubr.f32.mxu0 %v2619_v4  ;;  %2211 = vmatpush3.msra.mxu0 %v164_v41 }
  0x28   :  { %2212 = vmatprep.subr.mxu0 %v179_v42  ;;  %2189 = vmatprep.subr.mxu1 %v173_v54 }
  0x29   :  { %2213 = vmatpush3.msra.mxu0 %v163_v43  ;;  %2190 = vmatpush3.msra.mxu1 %v157_v55 }
  0x2a   :  { %145 = vmatmul.mubr.f32.gmra.mxu0 %v35_v40  ;;  %2214 = vmatprep.subr.mxu0 %v178_v44 }
  0x2b   :  { %2215 = vmatpush3.msra.mxu0 %v162_v45  ;;  %2191 = vmatprep.subr.mxu1 %v172_v56 }
  0x2c   :  { %2216 = vmatprep.subr.mxu0 %v177_v46  ;;  %2192 = vmatpush3.msra.mxu1 %v156_v57 }
  0x2d   :  { %2217 = vmatpush3.msra.mxu0 %v161_v47  ;;  %2193 = vmatprep.subr.mxu1 %v171_v58 }
  0x2e   :  { %2218 = vmatprep.subr.mxu0 %v176_v48  ;;  %2194 = vmatpush3.msra.mxu1 %v155_v59 }
  0x2f   :  { %2219 = vmatpush3.msra.mxu0 %v160_v49  ;;  %2195 = vmatprep.subr.mxu1 %v170_v60 }
  0x30   :  { %2220 = vmatprep.subr.mxu0 %v175_v50  ;;  %2196 = vmatpush3.msra.mxu1 %v154_v61 }
  0x31   :  { %2221 = vmatpush3.msra.mxu0 %v159_v51  ;;  %2197 = vmatprep.subr.mxu1 %v169_v62 }
  0x32   :  { %2222 = vmatprep.subr.mxu0 %v174_v52  ;;  %2198 = vmatpush3.msra.mxu1 %v153_v63 }
  0x33   :  { %2223 = vmatpush3.msra.mxu0 %v158_v53  ;;  %2199 = vmatprep.subr.mxu1 %v168_v0  ;;  %v186_v53 = vld [vmem:[%s4270_s3 + $0x18] sm:$0xff] }
  0x34   :  { %2224 = vmatprep.subr.mxu0 %v173_v54  ;;  %2200 = vmatpush3.msra.mxu1 %v152_v1  ;;  %v2916_v54 = vld [vmem:[%s4270_s3 + $0x10] sm:$0xff] }
  0x35   :  { %2225 = vmatpush3.msra.mxu0 %v157_v55  ;;  %2201 = vmatprep.subr.mxu1 %v167_v2  ;;  %v2922_v55 = vld [vmem:[%s4270_s3 + $0x8] sm:$0xff] }
  0x36   :  { %2226 = vmatprep.subr.mxu0 %v172_v56  ;;  %2202 = vmatpush3.msra.mxu1 %v151_v3  ;;  %v2928_v56 = vld [vmem:[%s4270_s3] sm:$0xff] }
  0x37   :  { %2227 = vmatpush3.msra.mxu0 %v156_v57  ;;  %408 = vmatprep.subr.mxu1 %v186_v53  ;;  %v689_v57 = vld [vmem:[%s4271_s4 + $0x2f8] sm:$0xff] }
  0x38   :  { %2228 = vmatprep.subr.mxu0 %v171_v58  ;;  %v688_v58 = vld [vmem:[%s4271_s4 + $0x2f0] sm:$0xff] }
  0x39   :  { %2229 = vmatpush3.msra.mxu0 %v155_v59  ;;  %v687_v59 = vld [vmem:[%s4271_s4 + $0x2e8] sm:$0xff] }
  0x3a   :  { %2230 = vmatprep.subr.mxu0 %v170_v60  ;;  %v686_v60 = vld [vmem:[%s4271_s4 + $0x2e0] sm:$0xff] }
  0x3b   :  { %2231 = vmatpush3.msra.mxu0 %v154_v61  ;;  %v685_v61 = vld [vmem:[%s4271_s4 + $0x2d8] sm:$0xff] }
  0x3c   :  { %2232 = vmatprep.subr.mxu0 %v169_v62  ;;  %v684_v62 = vld [vmem:[%s4271_s4 + $0x2d0] sm:$0xff] }
  0x3d   :  { %2233 = vmatpush3.msra.mxu0 %v153_v63  ;;  %v683_v63 = vld [vmem:[%s4271_s4 + $0x2c8] sm:$0xff] }
  0x3e   :  { %2234 = vmatprep.subr.mxu0 %v168_v0  ;;  %v682_v0 = vld [vmem:[%s4271_s4 + $0x2c0] sm:$0xff] }
  0x3f   :  { %2235 = vmatpush3.msra.mxu0 %v152_v1  ;;  %v681_v1 = vld [vmem:[%s4271_s4 + $0x2b8] sm:$0xff] }
  0x40   :  { %2236 = vmatprep.subr.mxu0 %v167_v2  ;;  %v680_v2 = vld [vmem:[%s4271_s4 + $0x2b0] sm:$0xff] }
  0x41   :  { %2237 = vmatpush3.msra.mxu0 %v151_v3  ;;  %v679_v3 = vld [vmem:[%s4271_s4 + $0x2a8] sm:$0xff] }
  0x42   :  { %799 = vmatprep.subr.mxu0 %v689_v57  ;;  %v603_v57 = vld [vmem:[%s4271_s4 + $0x48] sm:$0xff] }
  0xe2   :  { %v2875_v5 = vpop.f32.mrf.mxu0 }
  0xe3   :  { %v206_v10 = vmul.f32 %v2875_v5, %v2875_v5 }
  0xe4   :  { %v2877_v6 = vpop.f32.mrf.mxu0 }
  0xe5   :  { %v207_v16 = vmul.f32 %v2877_v6, %v2877_v6 }
  0xe6   :  { %v2879_v7 = vpop.f32.mrf.mxu0 }
  0xe7   :  { %v208_v8 = vmul.f32 %v2879_v7, %v2879_v7  ;;  %v187_v11 = vadd.f32 %v2879_v7, %v2875_v5 }
  0xe8   :  { %v2883_v9 = vpop.f32.mrf.mxu0 }
  0xe9   :  { %v209_v12 = vmul.f32 %v2883_v9, %v2883_v9  ;;  %v212_v17 = vadd.f32 %v208_v8, %v206_v10  ;;  %v197_v18 = vadd.f32 %v2883_v9, %v2877_v6  ;;  %v678_v8 = vld [vmem:[%s4271_s4 + $0x2a0] sm:$0xff]  ;;  %v677_v10 = vld [vmem:[%s4271_s4 + $0x298] sm:$0xff] }
  0xea   :  { %v2891_v13 = vpop.f32.mrf.mxu0 }
  0xeb   :  { %v189_v14 = vsel %vm188_vm0, %v2891_v13, 0.0  ;;  %v210_v15 = vmul.f32 %v2891_v13, %v2891_v13  ;;  %v221_v24 = vadd.f32 %v209_v12, %v207_v16  ;;  %v675_v12 = vld [vmem:[%s4271_s4 + $0x288] sm:$0xff]  ;;  %v672_v16 = vld [vmem:[%s4271_s4 + $0x270] sm:$0xff] }
  0xec   :  { %v190_v19 = vadd.f32 %v189_v14, %v187_v11  ;;  %v2901_v20 = vpop.f32.mrf.mxu0  ;;  %v676_v11 = vld [vmem:[%s4271_s4 + $0x290] sm:$0xff]  ;;  %v674_v14 = vld [vmem:[%s4271_s4 + $0x280] sm:$0xff] }
  0xed   :  { %v213_v21 = vsel %vm188_vm0, %v210_v15, 0.0  ;;  %v198_v22 = vsel %vm188_vm0, %v2901_v20, 0.0  ;;  %v211_v23 = vmul.f32 %v2901_v20, %v2901_v20  ;;  %v673_v15 = vld [vmem:[%s4271_s4 + $0x278] sm:$0xff] }
  0xee   :  { %v191_v25 = vrot.slane %v190_v19, 4  ;;  %v214_v26 = vadd.f32 %v213_v21, %v212_v17  ;;  %v199_v27 = vadd.f32 %v198_v22, %v197_v18  ;;  %v671_v17 = vld [vmem:[%s4271_s4 + $0x268] sm:$0xff]  ;;  %v670_v18 = vld [vmem:[%s4271_s4 + $0x260] sm:$0xff]  ;;  %v668_v21 = vld [vmem:[%s4271_s4 + $0x250] sm:$0xff] }
  0xef   :  { %v222_v28 = vsel %vm188_vm0, %v211_v23, 0.0  ;;  %v667_v22 = vld [vmem:[%s4271_s4 + $0x248] sm:$0xff] }
  0xf0   :  { %v192_v29 = vadd.f32 %v191_v25, %v190_v19  ;;  %v215_v30 = vrot.slane %v214_v26, 4  ;;  %v223_v31 = vadd.f32 %v222_v28, %v221_v24  ;;  %v200_v32 = vrot.slane %v199_v27, 4  ;;  %v669_v19 = vld [vmem:[%s4271_s4 + $0x258] sm:$0xff] }
  0xf2   :  { %v216_v33 = vadd.f32 %v215_v30, %v214_v26  ;;  %v224_v34 = vrot.slane %v223_v31, 4  ;;  %v201_v35 = vadd.f32 %v200_v32, %v199_v27  ;;  %v193_v36 = vrot.slane %v192_v29, 2  ;;  %v625_v32 = vld [vmem:[%s4271_s4 + $0xf8] sm:$0xff] }
  0xf4   :  { %v217_v37 = vrot.slane %v216_v33, 2  ;;  %v202_v38 = vrot.slane %v201_v35, 2  ;;  %v194_v39 = vadd.f32 %v193_v36, %v192_v29  ;;  %v225_v40 = vadd.f32 %v224_v34, %v223_v31 }
  0xf6   :  { %v218_v41 = vadd.f32 %v217_v37, %v216_v33  ;;  %v203_v42 = vadd.f32 %v202_v38, %v201_v35  ;;  %v226_v43 = vrot.slane %v225_v40, 2  ;;  %v195_v44 = vrot.slane %v194_v39, 1  ;;  %v624_v35 = vld [vmem:[%s4271_s4 + $0xf0] sm:$0xff]  ;;  %v623_v37 = vld [vmem:[%s4271_s4 + $0xe8] sm:$0xff]  ;;  %v622_v38 = vld [vmem:[%s4271_s4 + $0xe0] sm:$0xff] }
  0xf8   :  { %v204_v45 = vrot.slane %v203_v42, 1  ;;  %v227_v46 = vadd.f32 %v226_v43, %v225_v40  ;;  %v219_v47 = vrot.slane %v218_v41, 1  ;;  %v196_v50 = vadd.f32 %v195_v44, %v194_v39  ;;  %v621_v39 = vld [vmem:[%s4271_s4 + $0xd8] sm:$0xff]  ;;  %v620_v40 = vld [vmem:[%s4271_s4 + $0xd0] sm:$0xff] }
  0xf9   :  { %v617_v43 = vld [vmem:[%s4271_s4 + $0xb8] sm:$0xff]  ;;  %v616_v44 = vld [vmem:[%s4271_s4 + $0xb0] sm:$0xff] }
  0xfa   :  { %v205_v48 = vadd.f32 %v204_v45, %v203_v42  ;;  %v228_v49 = vrot.slane %v227_v46, 1  ;;  %v220_v52 = vadd.f32 %v219_v47, %v218_v41  ;;  %v619_v41 = vld [vmem:[%s4271_s4 + $0xc8] sm:$0xff]  ;;  %v618_v42 = vld [vmem:[%s4271_s4 + $0xc0] sm:$0xff]  ;;  %v613_v47 = vld [vmem:[%s4271_s4 + $0x98] sm:$0xff] }
  0xfb   :  { %v615_v45 = vld [vmem:[%s4271_s4 + $0xa8] sm:$0xff] }
  0xfc   :  { %294 = vmatprep.mubr.f32.mxu1 %v205_v48  ;;  %v229_v51 = vadd.f32 %v228_v49, %v227_v46  ;;  %v614_v46 = vld [vmem:[%s4271_s4 + $0xa0] sm:$0xff]  ;;  %v612_v48 = vld [vmem:[%s4271_s4 + $0x90] sm:$0xff]  ;;  %v611_v49 = vld [vmem:[%s4271_s4 + $0x88] sm:$0xff] }
  0xfd   :  { %295 = vmatmul.mubr.f32.vlgmr.msra.gmra.mxu1 %v196_v50  ;;  %v610_v50 = vld [vmem:[%s4271_s4 + $0x80] sm:$0xff] }
  0xfe   :  { %365 = vmatprep.mubr.f32.mxu0 %v229_v51  ;;  %444 = vmatprep.mubr.f32.mxu1 %v2619_v4  ;;  %v609_v51 = vld [vmem:[%s4271_s4 + $0x78] sm:$0xff] }
  0xff   :  { %366 = vmatmul.mubr.f32.vlgmr.msra.gmra.mxu0 %v220_v52  ;;  %409 = vmatpush1.msra.mxu1 %v2916_v54  ;;  %v608_v52 = vld [vmem:[%s4271_s4 + $0x70] sm:$0xff] }
 0x100   :  { %410 = vmatprep.subr.mxu1 %v2922_v55  ;;  %800 = vmatpush1.msra.mxu0 %v688_v58  ;;  %v602_v58 = vld [vmem:[%s4271_s4 + $0x40] sm:$0xff] }
 0x101   :  { %411 = vmatpush1.msra.mxu1 %v2928_v56  ;;  %801 = vmatprep.subr.mxu0 %v687_v59  ;;  %v601_v59 = vld [vmem:[%s4271_s4 + $0x38] sm:$0xff] }
 0x102   :  { %482 = vmatprep.subr.mxu1 %v186_v53  ;;  %802 = vmatpush1.msra.mxu0 %v686_v60  ;;  %v607_v53 = vld [vmem:[%s4271_s4 + $0x68] sm:$0xff]  ;;  %v600_v60 = vld [vmem:[%s4271_s4 + $0x30] sm:$0xff] }
 0x103   :  { %803 = vmatprep.subr.mxu0 %v685_v61  ;;  %v599_v61 = vld [vmem:[%s4271_s4 + $0x28] sm:$0xff] }
 0x104   :  { %804 = vmatpush1.msra.mxu0 %v684_v62  ;;  %v598_v62 = vld [vmem:[%s4271_s4 + $0x20] sm:$0xff] }
 0x105   :  { %805 = vmatprep.subr.mxu0 %v683_v63  ;;  %v597_v63 = vld [vmem:[%s4271_s4 + $0x18] sm:$0xff] }
 0x106   :  { %806 = vmatpush1.msra.mxu0 %v682_v0  ;;  %v596_v0 = vld [vmem:[%s4271_s4 + $0x10] sm:$0xff] }
 0x107   :  { %807 = vmatprep.subr.mxu0 %v681_v1  ;;  %v595_v1 = vld [vmem:[%s4271_s4 + $0x8] sm:$0xff] }
 0x108   :  { %808 = vmatpush1.msra.mxu0 %v680_v2  ;;  %v594_v2 = vld [vmem:[%s4271_s4] sm:$0xff] }
 0x109   :  { %809 = vmatprep.subr.mxu0 %v679_v3  ;;  %v657_v3 = vld [vmem:[%s4271_s4 + $0x1f8] sm:$0xff] }
 0x10a   :  { %810 = vmatpush1.msra.mxu0 %v678_v8  ;;  %v656_v8 = vld [vmem:[%s4271_s4 + $0x1f0] sm:$0xff] }
 0x10b   :  { %811 = vmatprep.subr.mxu0 %v677_v10  ;;  %v666_v10 = vld [vmem:[%s4271_s4 + $0x240] sm:$0xff] }
 0x10c   :  { %812 = vmatpush1.msra.mxu0 %v676_v11  ;;  %v655_v11 = vld [vmem:[%s4271_s4 + $0x1e8] sm:$0xff] }
 0x10d   :  { %813 = vmatprep.subr.mxu0 %v675_v12  ;;  %v665_v12 = vld [vmem:[%s4271_s4 + $0x238] sm:$0xff] }
 0x10e   :  { %814 = vmatpush1.msra.mxu0 %v674_v14  ;;  %v654_v14 = vld [vmem:[%s4271_s4 + $0x1e0] sm:$0xff] }
 0x10f   :  { %815 = vmatprep.subr.mxu0 %v673_v15  ;;  %v664_v15 = vld [vmem:[%s4271_s4 + $0x230] sm:$0xff] }
 0x110   :  { %816 = vmatpush1.msra.mxu0 %v672_v16  ;;  %v653_v16 = vld [vmem:[%s4271_s4 + $0x1d8] sm:$0xff] }
 0x111   :  { %817 = vmatprep.subr.mxu0 %v671_v17  ;;  %v663_v17 = vld [vmem:[%s4271_s4 + $0x228] sm:$0xff] }
 0x112   :  { %818 = vmatpush1.msra.mxu0 %v670_v18  ;;  %v652_v18 = vld [vmem:[%s4271_s4 + $0x1d0] sm:$0xff] }
 0x113   :  { %819 = vmatprep.subr.mxu0 %v669_v19  ;;  %v662_v19 = vld [vmem:[%s4271_s4 + $0x220] sm:$0xff] }
 0x114   :  { %820 = vmatpush1.msra.mxu0 %v668_v21  ;;  %v651_v21 = vld [vmem:[%s4271_s4 + $0x1c8] sm:$0xff] }
 0x115   :  { %821 = vmatprep.subr.mxu0 %v667_v22  ;;  %v661_v22 = vld [vmem:[%s4271_s4 + $0x218] sm:$0xff] }
 0x116   :  { %822 = vmatpush1.msra.mxu0 %v666_v10  ;;  %v627_v10 = vld [vmem:[%s4271_s4 + $0x108] sm:$0xff] }
 0x117   :  { %823 = vmatprep.subr.mxu0 %v665_v12  ;;  %v626_v12 = vld [vmem:[%s4271_s4 + $0x100] sm:$0xff] }
 0x118   :  { %824 = vmatpush1.msra.mxu0 %v664_v15  ;;  %v699_v15 = vld [vmem:[%s4271_s4 + $0x348] sm:$0xff] }
 0x119   :  { %825 = vmatprep.subr.mxu0 %v663_v17  ;;  %v697_v17 = vld [vmem:[%s4271_s4 + $0x338] sm:$0xff] }
 0x11a   :  { %826 = vmatpush1.msra.mxu0 %v662_v19  ;;  %v695_v19 = vld [vmem:[%s4271_s4 + $0x328] sm:$0xff] }
 0x11b   :  { %827 = vmatprep.subr.mxu0 %v661_v22  ;;  %v693_v22 = vld [vmem:[%s4271_s4 + $0x318] sm:$0xff] }
 0x1bd   :  { %v2203_v23 = vpop.f32.mrf.mxu1 }
 0x1bf   :  { %v2204_v24 = vpop.f32.mrf.mxu1  ;;  %v2238_v25 = vpop.f32.mrf.mxu0 }
 0x1c0   :  { %v2205_v26 = vadd.f32 %v2204_v24, %v2203_v23  ;;  %v650_v23 = vld [vmem:[%s4271_s4 + $0x1c0] sm:$0xff]  ;;  %v660_v24 = vld [vmem:[%s4271_s4 + $0x210] sm:$0xff] }
 0x1c1   :  { %v2239_v27 = vpop.f32.mrf.mxu0  ;;  %828 = vmatpush1.msra.mxu0 %v660_v24  ;;  %v691_v24 = vld [vmem:[%s4271_s4 + $0x308] sm:$0xff] }
 0x1c2   :  { %v300_v28 = vmul.f32 0.0061728396, %v2205_v26  ;;  %v2240_v29 = vadd.f32 %v2239_v27, %v2238_v25  ;;  %v659_v25 = vld [vmem:[%s4271_s4 + $0x208] sm:$0xff]  ;;  %v658_v26 = vld [vmem:[%s4271_s4 + $0x200] sm:$0xff]  ;;  %v721_v27 = vld [vmem:[%s4271_s4 + $0x3f8] sm:$0xff] }
 0x1c3   :  { %829 = vmatprep.subr.mxu0 %v659_v25  ;;  %v690_v25 = vld [vmem:[%s4271_s4 + $0x300] sm:$0xff] }
 0x1c4   :  { %v372_v30 = vmul.f32 %v300_v28, %v300_v28  ;;  %v371_v31 = vmul.f32 0.0061728396, %v2240_v29  ;;  %2166 = vmatmul.mubr.msk.f32.vlgmr.msra.gmra.mxu1 %vm376_vm1, %v300_v28  ;;  %v720_v28 = vld [vmem:[%s4271_s4 + $0x3f0] sm:$0xff]  ;;  %v649_v29 = vld [vmem:[%s4271_s4 + $0x1b8] sm:$0xff]  ;;  %830 = vmatpush1.msra.mxu0 %v658_v26 }
 0x1c5   :  { %483 = vmatpush1.msra.mxu1 %v2916_v54  ;;  %518 = vmatprep.mubr.f32.mxu1 %v2619_v4  ;;  %v606_v54 = vld [vmem:[%s4271_s4 + $0x60] sm:$0xff]  ;;  %v907_v26 = vld [vmem:[%s4272_s5 + $0xf8] sm:$0xff] }
 0x1c6   :  { %v373_v33 = vsub.f32 %v371_v31, %v372_v30  ;;  %484 = vmatprep.subr.mxu1 %v2922_v55  ;;  %v605_v55 = vld [vmem:[%s4271_s4 + $0x58] sm:$0xff]  ;;  %v719_v30 = vld [vmem:[%s4271_s4 + $0x3e8] sm:$0xff]  ;;  %v648_v31 = vld [vmem:[%s4271_s4 + $0x1b0] sm:$0xff]  ;;  %831 = vmatprep.subr.mxu0 %v721_v27  ;;  %v525_v27 = vlaneseq }
 0x1c7   :  { %485 = vmatpush1.msra.mxu1 %v2928_v56  ;;  %v604_v56 = vld [vmem:[%s4271_s4 + $0x50] sm:$0xff]  ;;  %832 = vmatpush2.msra.mxu0 %v720_v28 }
 0x1c8   :  { %v374_v34 = vadd.f32 1e-05, %v373_v33  ;;  %722 = vmatprep.subr.mxu1 %v625_v32  ;;  %v718_v32 = vld [vmem:[%s4271_s4 + $0x3e0] sm:$0xff]  ;;  %v647_v33 = vld [vmem:[%s4271_s4 + $0x1a8] sm:$0xff]  ;;  %833 = vmatprep.subr.mxu0 %v719_v30  ;;  %v526_v28 = vshrl.u32 %v525_v27, 7 }
 0x1c9   :  { %834 = vmatpush2.msra.mxu0 %v718_v32  ;;  %v881_v27 = vld [vmem:[%s4272_s5 + $0x28] sm:$0xff] }
 0x1ca   :  { %2593 = vrsqrt.f32 %v374_v34  ;;  %v646_v34 = vld [vmem:[%s4271_s4 + $0x1a0] sm:$0xff]  ;;  %v3324_v30 = vsub.s32 0, %v526_v28 }
 0x1cb   :  { %v896_v28 = vld [vmem:[%s4272_s5 + $0xa0] sm:$0xff] }
 0x1d7   :  { %v2594_v36 = vpop.eup %2593 }
 0x1d8   :  { %2167 = vmatmul.mubr.msk.f32.vlgmr.msra.gmra.mxu1 %vm376_vm1, %v2594_v36  ;;  %v645_v36 = vld [vmem:[%s4271_s4 + $0x198] sm:$0xff] }
 0x1d9   :  { %723 = vmatpush1.msra.mxu1 %v624_v35  ;;  %v717_v35 = vld [vmem:[%s4271_s4 + $0x3d8] sm:$0xff] }
 0x1da   :  { %724 = vmatprep.subr.mxu1 %v623_v37  ;;  %v716_v37 = vld [vmem:[%s4271_s4 + $0x3d0] sm:$0xff]  ;;  %835 = vmatprep.subr.mxu0 %v717_v35 }
 0x1db   :  { %725 = vmatpush1.msra.mxu1 %v622_v38  ;;  %v644_v38 = vld [vmem:[%s4271_s4 + $0x190] sm:$0xff]  ;;  %836 = vmatpush2.msra.mxu0 %v716_v37 }
 0x1dc   :  { %726 = vmatprep.subr.mxu1 %v621_v39  ;;  %v643_v39 = vld [vmem:[%s4271_s4 + $0x188] sm:$0xff] }
 0x1dd   :  { %727 = vmatpush1.msra.mxu1 %v620_v40  ;;  %v715_v40 = vld [vmem:[%s4271_s4 + $0x3c8] sm:$0xff] }
 0x1de   :  { %728 = vmatprep.subr.mxu1 %v619_v41  ;;  %v642_v41 = vld [vmem:[%s4271_s4 + $0x180] sm:$0xff]  ;;  %837 = vmatprep.subr.mxu0 %v715_v40 }
 0x1df   :  { %729 = vmatpush1.msra.mxu1 %v618_v42  ;;  %v714_v42 = vld [vmem:[%s4271_s4 + $0x3c0] sm:$0xff] }
 0x1e0   :  { %730 = vmatprep.subr.mxu1 %v617_v43  ;;  %v713_v43 = vld [vmem:[%s4271_s4 + $0x3b8] sm:$0xff]  ;;  %838 = vmatpush2.msra.mxu0 %v714_v42 }
 0x1e1   :  { %731 = vmatpush1.msra.mxu1 %v616_v44  ;;  %v641_v44 = vld [vmem:[%s4271_s4 + $0x178] sm:$0xff]  ;;  %839 = vmatprep.subr.mxu0 %v713_v43 }
 0x1e2   :  { %732 = vmatprep.subr.mxu1 %v615_v45  ;;  %v712_v45 = vld [vmem:[%s4271_s4 + $0x3b0] sm:$0xff] }
 0x1e3   :  { %733 = vmatpush1.msra.mxu1 %v614_v46  ;;  %v640_v46 = vld [vmem:[%s4271_s4 + $0x170] sm:$0xff]  ;;  %840 = vmatpush2.msra.mxu0 %v712_v45 }
 0x1e4   :  { %734 = vmatprep.subr.mxu1 %v613_v47  ;;  %v711_v47 = vld [vmem:[%s4271_s4 + $0x3a8] sm:$0xff] }
 0x1e5   :  { %735 = vmatpush1.msra.mxu1 %v612_v48  ;;  %v639_v48 = vld [vmem:[%s4271_s4 + $0x168] sm:$0xff]  ;;  %841 = vmatprep.subr.mxu0 %v711_v47 }
 0x1e6   :  { %736 = vmatprep.subr.mxu1 %v611_v49  ;;  %v638_v49 = vld [vmem:[%s4271_s4 + $0x160] sm:$0xff] }
 0x1e7   :  { %737 = vmatpush1.msra.mxu1 %v610_v50  ;;  %v637_v50 = vld [vmem:[%s4271_s4 + $0x158] sm:$0xff] }
 0x1e8   :  { %738 = vmatprep.subr.mxu1 %v609_v51  ;;  %v710_v51 = vld [vmem:[%s4271_s4 + $0x3a0] sm:$0xff] }
 0x1e9   :  { %739 = vmatpush1.msra.mxu1 %v608_v52  ;;  %v636_v52 = vld [vmem:[%s4271_s4 + $0x150] sm:$0xff]  ;;  %842 = vmatpush2.msra.mxu0 %v710_v51 }
 0x1ea   :  { %740 = vmatprep.subr.mxu1 %v607_v53  ;;  %v709_v53 = vld [vmem:[%s4271_s4 + $0x398] sm:$0xff] }
 0x1eb   :  { %741 = vmatpush1.msra.mxu1 %v606_v54  ;;  %v635_v54 = vld [vmem:[%s4271_s4 + $0x148] sm:$0xff]  ;;  %843 = vmatprep.subr.mxu0 %v709_v53 }
 0x1ec   :  { %742 = vmatprep.subr.mxu1 %v605_v55  ;;  %v634_v55 = vld [vmem:[%s4271_s4 + $0x140] sm:$0xff]  ;;  %v905_v53 = vld [vmem:[%s4272_s5 + $0xe8] sm:$0xff] }
 0x1ed   :  { %743 = vmatpush1.msra.mxu1 %v604_v56  ;;  %v708_v56 = vld [vmem:[%s4271_s4 + $0x390] sm:$0xff] }
 0x1ee   :  { %744 = vmatprep.subr.mxu1 %v603_v57  ;;  %v633_v57 = vld [vmem:[%s4271_s4 + $0x138] sm:$0xff]  ;;  %844 = vmatpush2.msra.mxu0 %v708_v56 }
 0x1ef   :  { %745 = vmatpush1.msra.mxu1 %v602_v58  ;;  %v707_v58 = vld [vmem:[%s4271_s4 + $0x388] sm:$0xff] }
 0x1f0   :  { %746 = vmatprep.subr.mxu1 %v601_v59  ;;  %v632_v59 = vld [vmem:[%s4271_s4 + $0x130] sm:$0xff]  ;;  %845 = vmatprep.subr.mxu0 %v707_v58 }
 0x1f1   :  { %747 = vmatpush1.msra.mxu1 %v600_v60  ;;  %v706_v60 = vld [vmem:[%s4271_s4 + $0x380] sm:$0xff] }
 0x1f2   :  { %748 = vmatprep.subr.mxu1 %v599_v61  ;;  %v631_v61 = vld [vmem:[%s4271_s4 + $0x128] sm:$0xff]  ;;  %846 = vmatpush2.msra.mxu0 %v706_v60 }
 0x1f3   :  { %749 = vmatpush1.msra.mxu1 %v598_v62  ;;  %v705_v62 = vld [vmem:[%s4271_s4 + $0x378] sm:$0xff] }
 0x1f4   :  { %750 = vmatprep.subr.mxu1 %v597_v63  ;;  %v630_v63 = vld [vmem:[%s4271_s4 + $0x120] sm:$0xff]  ;;  %847 = vmatprep.subr.mxu0 %v705_v62 }
 0x1f5   :  { %751 = vmatpush1.msra.mxu1 %v596_v0  ;;  %v704_v0 = vld [vmem:[%s4271_s4 + $0x370] sm:$0xff] }
 0x1f6   :  { %752 = vmatprep.subr.mxu1 %v595_v1  ;;  %v629_v1 = vld [vmem:[%s4271_s4 + $0x118] sm:$0xff]  ;;  %848 = vmatpush2.msra.mxu0 %v704_v0 }
 0x1f7   :  { %753 = vmatpush1.msra.mxu1 %v594_v2  ;;  %v703_v2 = vld [vmem:[%s4271_s4 + $0x368] sm:$0xff] }
 0x1f8   :  { %754 = vmatprep.subr.mxu1 %v657_v3  ;;  %v628_v3 = vld [vmem:[%s4271_s4 + $0x110] sm:$0xff]  ;;  %849 = vmatprep.subr.mxu0 %v703_v2 }
 0x1f9   :  { %755 = vmatpush2.msra.mxu1 %v656_v8  ;;  %v702_v8 = vld [vmem:[%s4271_s4 + $0x360] sm:$0xff] }
 0x1fa   :  { %756 = vmatprep.subr.mxu1 %v655_v11  ;;  %850 = vmatpush2.msra.mxu0 %v702_v8  ;;  %v701_v11 = vld [vmem:[%s4271_s4 + $0x358] sm:$0xff]  ;;  %v889_v8 = vld [vmem:[%s4272_s5 + $0x68] sm:$0xff] }
 0x1fb   :  { %757 = vmatpush2.msra.mxu1 %v654_v14  ;;  %851 = vmatprep.subr.mxu0 %v701_v11  ;;  %v700_v14 = vld [vmem:[%s4271_s4 + $0x350] sm:$0xff]  ;;  %v888_v11 = vld [vmem:[%s4272_s5 + $0x60] sm:$0xff] }
 0x1fc   :  { %758 = vmatprep.subr.mxu1 %v653_v16  ;;  %v698_v16 = vld [vmem:[%s4271_s4 + $0x340] sm:$0xff]  ;;  %852 = vmatpush2.msra.mxu0 %v700_v14  ;;  %v887_v14 = vld [vmem:[%s4272_s5 + $0x58] sm:$0xff] }
 0x1fd   :  { %759 = vmatpush2.msra.mxu1 %v652_v18  ;;  %853 = vmatprep.subr.mxu0 %v699_v15  ;;  %v696_v18 = vld [vmem:[%s4271_s4 + $0x330] sm:$0xff] }
 0x1fe   :  { %760 = vmatprep.subr.mxu1 %v651_v21  ;;  %854 = vmatpush2.msra.mxu0 %v698_v16  ;;  %v694_v21 = vld [vmem:[%s4271_s4 + $0x320] sm:$0xff]  ;;  %v902_v15 = vld [vmem:[%s4272_s5 + $0xd0] sm:$0xff] }
 0x1ff   :  { %761 = vmatpush2.msra.mxu1 %v650_v23  ;;  %855 = vmatprep.subr.mxu0 %v697_v17  ;;  %v692_v23 = vld [vmem:[%s4271_s4 + $0x310] sm:$0xff]  ;;  %v901_v17 = vld [vmem:[%s4272_s5 + $0xc8] sm:$0xff] }
 0x200   :  { %762 = vmatprep.subr.mxu1 %v649_v29  ;;  %856 = vmatpush2.msra.mxu0 %v696_v18  ;;  %v886_v16 = vld [vmem:[%s4272_s5 + $0x50] sm:$0xff]  ;;  %v885_v18 = vld [vmem:[%s4272_s5 + $0x48] sm:$0xff] }
 0x201   :  { %763 = vmatpush2.msra.mxu1 %v648_v31  ;;  %857 = vmatprep.subr.mxu0 %v695_v19  ;;  %v900_v19 = vld [vmem:[%s4272_s5 + $0xc0] sm:$0xff] }
 0x202   :  { %764 = vmatprep.subr.mxu1 %v647_v33  ;;  %858 = vmatpush2.msra.mxu0 %v694_v21  ;;  %v884_v21 = vld [vmem:[%s4272_s5 + $0x40] sm:$0xff] }
 0x203   :  { %765 = vmatpush2.msra.mxu1 %v646_v34  ;;  %859 = vmatprep.subr.mxu0 %v693_v22  ;;  %v899_v22 = vld [vmem:[%s4272_s5 + $0xb8] sm:$0xff] }
 0x204   :  { %766 = vmatprep.subr.mxu1 %v645_v36  ;;  %860 = vmatpush2.msra.mxu0 %v692_v23  ;;  %v883_v23 = vld [vmem:[%s4272_s5 + $0x38] sm:$0xff] }
 0x205   :  { %767 = vmatpush2.msra.mxu1 %v644_v38  ;;  %861 = vmatprep.subr.mxu0 %v691_v24  ;;  %v898_v24 = vld [vmem:[%s4272_s5 + $0xb0] sm:$0xff] }
 0x206   :  { %768 = vmatprep.subr.mxu1 %v643_v39  ;;  %862 = vmatpush2.msra.mxu0 %v690_v25  ;;  %v882_v25 = vld [vmem:[%s4272_s5 + $0x30] sm:$0xff] }
 0x207   :  { %769 = vmatpush2.msra.mxu1 %v642_v41  ;;  %2276 = vmatprep.subr.mxu0 %v907_v26 }
 0x208   :  { %770 = vmatprep.subr.mxu1 %v641_v44 }
 0x209   :  { %771 = vmatpush2.msra.mxu1 %v640_v46 }
 0x20a   :  { %772 = vmatprep.subr.mxu1 %v639_v48 }
 0x20b   :  { %773 = vmatpush2.msra.mxu1 %v638_v49 }
 0x20c   :  { %774 = vmatprep.subr.mxu1 %v637_v50 }
 0x20d   :  { %775 = vmatpush2.msra.mxu1 %v636_v52  ;;  %v891_v52 = vld [vmem:[%s4272_s5 + $0x78] sm:$0xff] }
 0x20e   :  { %776 = vmatprep.subr.mxu1 %v635_v54 }
 0x20f   :  { %777 = vmatpush2.msra.mxu1 %v634_v55 }
 0x210   :  { %778 = vmatprep.subr.mxu1 %v633_v57 }
 0x211   :  { %779 = vmatpush2.msra.mxu1 %v632_v59 }
 0x212   :  { %780 = vmatprep.subr.mxu1 %v631_v61 }
 0x213   :  { %781 = vmatpush2.msra.mxu1 %v630_v63 }
 0x214   :  { %782 = vmatprep.subr.mxu1 %v629_v1 }
 0x215   :  { %783 = vmatpush2.msra.mxu1 %v628_v3 }
 0x216   :  { %784 = vmatprep.subr.mxu1 %v627_v10  ;;  %v904_v10 = vld [vmem:[%s4272_s5 + $0xe0] sm:$0xff] }
 0x217   :  { %785 = vmatpush2.msra.mxu1 %v626_v12  ;;  %v903_v12 = vld [vmem:[%s4272_s5 + $0xd8] sm:$0xff] }
 0x218   :  { %2241 = vmatprep.subr.mxu1 %v907_v26  ;;  %v897_v26 = vld [vmem:[%s4272_s5 + $0xa8] sm:$0xff] }
 0x284   :  { %v446_v29 = vpop.f32.mrf.mxu1 }
 0x285   :  { %v528_v32 = vrot.slane %v446_v29, %v3324_v30  ;;  %v880_v29 = vld [vmem:[%s4272_s5 + $0x20] sm:$0xff] }
 0x286   :  { %v448_v31 = vpop.f32.mrf.mxu1 }
 0x287   :  { %v532_v33 = vrot.slane %v448_v31, %v3324_v30  ;;  %v533_v35 = vsub.f32 %v2875_v5, %v528_v32  ;;  %v535_v36 = vsub.f32 %v2879_v7, %v528_v32  ;;  %v537_v37 = vsub.f32 %v2891_v13, %v528_v32  ;;  %v895_v31 = vld [vmem:[%s4272_s5 + $0x98] sm:$0xff] }
 0x288   :  { %v879_v32 = vld [vmem:[%s4272_s5 + $0x18] sm:$0xff] }
 0x289   :  { %v534_v39 = vsub.f32 %v2877_v6, %v532_v33  ;;  %v536_v45 = vsub.f32 %v2883_v9, %v532_v33  ;;  %v538_v46 = vsub.f32 %v2901_v20, %v532_v33  ;;  %v906_v9 = vld [vmem:[%s4272_s5 + $0xf0] sm:$0xff] }
 0x28a   :  { %v890_v20 = vld [vmem:[%s4272_s5 + $0x70] sm:$0xff] }
 0x28b   :  { %v894_v33 = vld [vmem:[%s4272_s5 + $0x90] sm:$0xff] }
 0x298   :  { %v520_v34 = vpop.f32.mrf.mxu1 }
 0x299   :  { %v542_v38 = vrot.slane %v520_v34, %v3324_v30  ;;  %v878_v34 = vld [vmem:[%s4272_s5 + $0x10] sm:$0xff] }
 0x29a   :  { %v522_v40 = vpop.f32.mrf.mxu1 }
 0x29b   :  { %v547_v41 = vmul.f32 %v542_v38, %v533_v35  ;;  %v549_v42 = vmul.f32 %v542_v38, %v535_v36  ;;  %v551_v43 = vmul.f32 %v542_v38, %v537_v37  ;;  %v546_v44 = vrot.slane %v522_v40, %v3324_v30  ;;  %v893_v35 = vld [vmem:[%s4272_s5 + $0x88] sm:$0xff]  ;;  %v892_v37 = vld [vmem:[%s4272_s5 + $0x80] sm:$0xff] }
 0x29c   :  { %v877_v36 = vld [vmem:[%s4272_s5 + $0x8] sm:$0xff]  ;;  %v876_v38 = vld [vmem:[%s4272_s5] sm:$0xff] }
 0x29d   :  { %v553_v47 = vmax.f32 %v547_v41, 0.0  ;;  %v555_v5 = vmax.f32 %v549_v42, 0.0  ;;  %v557_v48 = vmax.f32 %v551_v43, 0.0  ;;  %v548_v7 = vmul.f32 %v546_v44, %v534_v39  ;;  %v3436_v39 = vld [vmem:[%s4273_s6 + $0x38] sm:$0xff] }
 0x29e   :  { %v550_v49 = vmul.f32 %v546_v44, %v536_v45  ;;  %v552_v13 = vmul.f32 %v546_v44, %v538_v46 }
 0x29f   :  { %559 = vst [vmem:[#allocation2 + $0x28] sm:$0xff] %v553_v47  ;;  %563 = vst [vmem:[#allocation2 + $0x18] sm:$0x3] %v557_v48  ;;  %v554_v50 = vmax.f32 %v548_v7, 0.0  ;;  %v581_v61 = vrot.slane %v555_v5, 2 }
 0x2a0   :  { %v556_v6 = vmax.f32 %v550_v49, 0.0  ;;  %v558_v51 = vmax.f32 %v552_v13, 0.0 }
 0x2a1   :  { %560 = vst [vmem:[#allocation2 + $0x10] sm:$0xff] %v554_v50  ;;  %786 = vmatprep.mubr.f32.mxu1 %v554_v50 }
 0x2a2   :  { %564 = vst [vmem:[#allocation2 + $0x20] sm:$0x3] %v558_v51  ;;  %787 = vmatmul.mubr.f32.vlgmr.msra.gmra.mxu1 %v553_v47  ;;  %v584_v57 = vrot.slane %v556_v6, 2 }
 0x2a3   :  { %792 = vmatprep.mubr.f32.mxu1 %v556_v6  ;;  %2242 = vmatpush3.msra.mxu1 %v891_v52 }
 0x2a4   :  { %2243 = vmatprep.subr.mxu1 %v906_v9 }
 0x2a5   :  { %2244 = vmatpush3.msra.mxu1 %v890_v20 }
 0x2a6   :  { %v569_v54 = vld [vmem:[#allocation2 + $0x28] sm:$0xfc]  ;;  %793 = vmatmul.mubr.f32.gmra.mxu1 %v555_v5  ;;  %2245 = vmatprep.subr.mxu1 %v905_v53  ;;  %v571_v60 = vld [vmem:[#allocation2 + $0x18] sm:$0x3] }
 0x2a7   :  { %v580_v56 = vrot.slane %v569_v54, 2  ;;  %v586_v1 = vrot.slane %v571_v60, 2  ;;  %2246 = vmatpush3.msra.mxu1 %v889_v8 }
 0x2a8   :  { %v570_v55 = vld [vmem:[#allocation2 + $0x10] sm:$0xfc]  ;;  %2247 = vmatprep.subr.mxu1 %v904_v10 }
 0x2a9   :  { %v583_v58 = vrot.slane %v570_v55, 2  ;;  %v572_v59 = vld [vmem:[#allocation2 + $0x20] sm:$0x3]  ;;  %v582_v0 = vsel %vm579_vm2, %v580_v56, %v581_v61  ;;  %v587_v3 = vsel %vm579_vm2, %v581_v61, %v586_v1  ;;  %2248 = vmatpush3.msra.mxu1 %v888_v11 }
 0x2aa   :  { %v588_v62 = vrot.slane %v572_v59, 2  ;;  %2249 = vmatprep.subr.mxu1 %v903_v12 }
 0x2ab   :  { %v585_v63 = vsel %vm579_vm2, %v583_v58, %v584_v57  ;;  %2250 = vmatpush3.msra.mxu1 %v887_v14 }
 0x2ac   :  { %863 = vmatprep.mubr.f32.mxu0 %v585_v63  ;;  %v589_v2 = vsel %vm579_vm2, %v584_v57, %v588_v62  ;;  %2251 = vmatprep.subr.mxu1 %v902_v15 }
 0x2ad   :  { %864 = vmatmul.mubr.f32.vlgmr.msra.gmra.mxu0 %v582_v0  ;;  %2252 = vmatpush3.msra.mxu1 %v886_v16 }
 0x2ae   :  { %869 = vmatprep.mubr.f32.mxu0 %v589_v2  ;;  %2277 = vmatpush3.msra.mxu0 %v891_v52 }
 0x2af   :  { %2278 = vmatprep.subr.mxu0 %v906_v9  ;;  %2253 = vmatprep.subr.mxu1 %v901_v17 }
 0x2b0   :  { %2279 = vmatpush3.msra.mxu0 %v890_v20  ;;  %2254 = vmatpush3.msra.mxu1 %v885_v18 }
 0x2b1   :  { %870 = vmatmul.mubr.f32.gmra.mxu0 %v587_v3  ;;  %2280 = vmatprep.subr.mxu0 %v905_v53 }
 0x2b2   :  { %2281 = vmatpush3.msra.mxu0 %v889_v8  ;;  %2255 = vmatprep.subr.mxu1 %v900_v19 }
 0x2b3   :  { %2282 = vmatprep.subr.mxu0 %v904_v10  ;;  %2256 = vmatpush3.msra.mxu1 %v884_v21 }
 0x2b4   :  { %2283 = vmatpush3.msra.mxu0 %v888_v11  ;;  %2257 = vmatprep.subr.mxu1 %v899_v22 }
 0x2b5   :  { %2284 = vmatprep.subr.mxu0 %v903_v12  ;;  %2258 = vmatpush3.msra.mxu1 %v883_v23 }
 0x2b6   :  { %2285 = vmatpush3.msra.mxu0 %v887_v14  ;;  %2259 = vmatprep.subr.mxu1 %v898_v24 }
 0x2b7   :  { %2286 = vmatprep.subr.mxu0 %v902_v15  ;;  %2260 = vmatpush3.msra.mxu1 %v882_v25 }
 0x2b8   :  { %2287 = vmatpush3.msra.mxu0 %v886_v16  ;;  %2261 = vmatprep.subr.mxu1 %v897_v26 }
 0x2b9   :  { %2288 = vmatprep.subr.mxu0 %v901_v17  ;;  %2262 = vmatpush3.msra.mxu1 %v881_v27 }
 0x2ba   :  { %2289 = vmatpush3.msra.mxu0 %v885_v18  ;;  %2263 = vmatprep.subr.mxu1 %v896_v28 }
 0x2bb   :  { %2290 = vmatprep.subr.mxu0 %v900_v19  ;;  %2264 = vmatpush3.msra.mxu1 %v880_v29 }
 0x2bc   :  { %2291 = vmatpush3.msra.mxu0 %v884_v21  ;;  %2265 = vmatprep.subr.mxu1 %v895_v31  ;;  %v914_v21 = vld [vmem:[%s4273_s6 + $0x30] sm:$0xff] }
 0x2bd   :  { %2292 = vmatprep.subr.mxu0 %v899_v22  ;;  %2266 = vmatpush3.msra.mxu1 %v879_v32  ;;  %v913_v22 = vld [vmem:[%s4273_s6 + $0x28] sm:$0xff] }
 0x2be   :  { %2293 = vmatpush3.msra.mxu0 %v883_v23  ;;  %2267 = vmatprep.subr.mxu1 %v894_v33  ;;  %v912_v23 = vld [vmem:[%s4273_s6 + $0x20] sm:$0xff] }
 0x2bf   :  { %2294 = vmatprep.subr.mxu0 %v898_v24  ;;  %2268 = vmatpush3.msra.mxu1 %v878_v34  ;;  %v911_v24 = vld [vmem:[%s4273_s6 + $0x18] sm:$0xff] }
 0x2c0   :  { %2295 = vmatpush3.msra.mxu0 %v882_v25  ;;  %2269 = vmatprep.subr.mxu1 %v893_v35  ;;  %v910_v25 = vld [vmem:[%s4273_s6 + $0x10] sm:$0xff] }
 0x2c1   :  { %2296 = vmatprep.subr.mxu0 %v897_v26  ;;  %2270 = vmatpush3.msra.mxu1 %v877_v36  ;;  %v909_v26 = vld [vmem:[%s4273_s6 + $0x8] sm:$0xff] }
 0x2c2   :  { %2297 = vmatpush3.msra.mxu0 %v881_v27  ;;  %2271 = vmatprep.subr.mxu1 %v892_v37  ;;  %v908_v27 = vld [vmem:[%s4273_s6] sm:$0xff] }
 0x2c3   :  { %2298 = vmatprep.subr.mxu0 %v896_v28  ;;  %2272 = vmatpush3.msra.mxu1 %v876_v38 }
 0x2c4   :  { %2299 = vmatpush3.msra.mxu0 %v880_v29  ;;  %1122 = vmatprep.subr.mxu1 %v3436_v39 }
 0x2c5   :  { %2300 = vmatprep.subr.mxu0 %v895_v31 }
 0x2c6   :  { %2301 = vmatpush3.msra.mxu0 %v879_v32 }
 0x2c7   :  { %2302 = vmatprep.subr.mxu0 %v894_v33 }
 0x2c8   :  { %2303 = vmatpush3.msra.mxu0 %v878_v34 }
 0x2c9   :  { %2304 = vmatprep.subr.mxu0 %v893_v35 }
 0x2ca   :  { %2305 = vmatpush3.msra.mxu0 %v877_v36 }
 0x2cb   :  { %2306 = vmatprep.subr.mxu0 %v892_v37 }
 0x2cc   :  { %2307 = vmatpush3.msra.mxu0 %v876_v38 }
 0x362   :  { %v788_v40 = vpop.f32.mrf.mxu1 }
 0x364   :  { %v790_v41 = vpop.f32.mrf.mxu1 }
 0x366   :  { %v794_v43 = vpop.f32.mrf.mxu1 }
 0x368   :  { %v796_v48 = vpop.f32.mrf.mxu1 }
 0x36d   :  { %v865_v42 = vpop.f32.mrf.mxu0 }
 0x36e   :  { %v3439_v45 = vadd.f32 %v865_v42, %v788_v40  ;;  %v1357_v42 = vld [vmem:[%s4274_s7 + $0xf0] sm:$0xff] }
 0x36f   :  { %v867_v44 = vpop.f32.mrf.mxu0 }
 0x370   :  { %v3441_v46 = vadd.f32 %v867_v44, %v790_v41  ;;  %v930_v49 = vmul.f32 %v3439_v45, %v3439_v45  ;;  %v1358_v41 = vld [vmem:[%s4274_s7 + $0xf8] sm:$0xff]  ;;  %v1341_v44 = vld [vmem:[%s4274_s7 + $0x70] sm:$0xff] }
 0x371   :  { %v871_v47 = vpop.f32.mrf.mxu0 }
 0x372   :  { %v3443_v5 = vadd.f32 %v871_v47, %v794_v43  ;;  %v931_v51 = vmul.f32 %v3441_v46, %v3441_v46  ;;  %v1390_v43 = vld [vmem:[%s4274_s7 + $0x1f8] sm:$0xff] }
 0x373   :  { %v873_v7 = vpop.f32.mrf.mxu0  ;;  %v1374_v47 = vld [vmem:[%s4274_s7 + $0x178] sm:$0xff]  ;;  %2346 = vmatprep.subr.mxu0 %v1390_v43  ;;  %v1375_v43 = vld [vmem:[%s4274_s7 + $0x180] sm:$0xff] }
 0x374   :  { %v916_v13 = vadd.f32 %v3443_v5, %v3439_v45  ;;  %v932_v50 = vmul.f32 %v3443_v5, %v3443_v5  ;;  %v3451_v6 = vadd.f32 %v873_v7, %v796_v48  ;;  %v1356_v48 = vld [vmem:[%s4274_s7 + $0xe8] sm:$0xff]  ;;  %v1389_v7 = vld [vmem:[%s4274_s7 + $0x1f0] sm:$0xff] }
 0x376   :  { %v917_v52 = vrot.slane %v916_v13, 4  ;;  %v934_v9 = vadd.f32 %v932_v50, %v930_v49  ;;  %v923_v20 = vadd.f32 %v3451_v6, %v3441_v46  ;;  %v933_v53 = vmul.f32 %v3451_v6, %v3451_v6  ;;  %v1340_v49 = vld [vmem:[%s4274_s7 + $0x68] sm:$0xff] }
 0x377   :  { %v1388_v50 = vld [vmem:[%s4274_s7 + $0x1e8] sm:$0xff] }
 0x378   :  { %v918_v54 = vadd.f32 %v917_v52, %v916_v13  ;;  %v935_v55 = vrot.slane %v934_v9, 4  ;;  %v924_v56 = vrot.slane %v923_v20, 4  ;;  %v941_v57 = vadd.f32 %v933_v53, %v931_v51  ;;  %v1373_v13 = vld [vmem:[%s4274_s7 + $0x170] sm:$0xff]  ;;  %v1355_v51 = vld [vmem:[%s4274_s7 + $0xe0] sm:$0xff]  ;;  %v1372_v52 = vld [vmem:[%s4274_s7 + $0x168] sm:$0xff] }
 0x379   :  { %v1354_v53 = vld [vmem:[%s4274_s7 + $0xd8] sm:$0xff] }
 0x37a   :  { %v919_v58 = vrot.slane %v918_v54, 2  ;;  %v936_v59 = vadd.f32 %v935_v55, %v934_v9  ;;  %v925_v60 = vadd.f32 %v924_v56, %v923_v20  ;;  %v942_v61 = vrot.slane %v941_v57, 4  ;;  %v1339_v9 = vld [vmem:[%s4274_s7 + $0x60] sm:$0xff]  ;;  %v1338_v55 = vld [vmem:[%s4274_s7 + $0x58] sm:$0xff] }
 0x37b   :  { %v1387_v20 = vld [vmem:[%s4274_s7 + $0x1e0] sm:$0xff]  ;;  %v1386_v56 = vld [vmem:[%s4274_s7 + $0x1d8] sm:$0xff] }
 0x37c   :  { %v920_v62 = vadd.f32 %v919_v58, %v918_v54  ;;  %v937_v63 = vrot.slane %v936_v59, 2  ;;  %v926_v0 = vrot.slane %v925_v60, 2  ;;  %v943_v1 = vadd.f32 %v942_v61, %v941_v57  ;;  %v1371_v54 = vld [vmem:[%s4274_s7 + $0x160] sm:$0xff]  ;;  %v1353_v57 = vld [vmem:[%s4274_s7 + $0xd0] sm:$0xff]  ;;  %v1370_v58 = vld [vmem:[%s4274_s7 + $0x158] sm:$0xff] }
 0x37d   :  { %v1352_v61 = vld [vmem:[%s4274_s7 + $0xc8] sm:$0xff] }
 0x37e   :  { %v938_v2 = vadd.f32 %v937_v63, %v936_v59  ;;  %v927_v3 = vadd.f32 %v926_v0, %v925_v60  ;;  %v944_v8 = vrot.slane %v943_v1, 2  ;;  %v921_v10 = vrot.slane %v920_v62, 1  ;;  %v1337_v59 = vld [vmem:[%s4274_s7 + $0x50] sm:$0xff]  ;;  %v1336_v63 = vld [vmem:[%s4274_s7 + $0x48] sm:$0xff] }
 0x37f   :  { %v1385_v60 = vld [vmem:[%s4274_s7 + $0x1d0] sm:$0xff]  ;;  %v1384_v0 = vld [vmem:[%s4274_s7 + $0x1c8] sm:$0xff] }
 0x380   :  { %v928_v11 = vrot.slane %v927_v3, 1  ;;  %v945_v12 = vadd.f32 %v944_v8, %v943_v1  ;;  %v939_v14 = vrot.slane %v938_v2, 1  ;;  %v922_v17 = vadd.f32 %v921_v10, %v920_v62  ;;  %v1369_v62 = vld [vmem:[%s4274_s7 + $0x150] sm:$0xff]  ;;  %v1351_v1 = vld [vmem:[%s4274_s7 + $0xc0] sm:$0xff]  ;;  %v1350_v8 = vld [vmem:[%s4274_s7 + $0xb8] sm:$0xff] }
 0x381   :  { %v1383_v10 = vld [vmem:[%s4274_s7 + $0x1c0] sm:$0xff] }
 0x382   :  { %v929_v15 = vadd.f32 %v928_v11, %v927_v3  ;;  %v946_v16 = vrot.slane %v945_v12, 1  ;;  %v940_v19 = vadd.f32 %v939_v14, %v938_v2  ;;  %v1335_v2 = vld [vmem:[%s4274_s7 + $0x40] sm:$0xff]  ;;  %v1368_v3 = vld [vmem:[%s4274_s7 + $0x148] sm:$0xff]  ;;  %v1334_v11 = vld [vmem:[%s4274_s7 + $0x38] sm:$0xff] }
 0x383   :  { %v1349_v14 = vld [vmem:[%s4274_s7 + $0xb0] sm:$0xff] }
 0x384   :  { %1012 = vmatprep.mubr.f32.mxu1 %v929_v15  ;;  %v947_v18 = vadd.f32 %v946_v16, %v945_v12  ;;  %v1367_v12 = vld [vmem:[%s4274_s7 + $0x140] sm:$0xff]  ;;  %v1382_v15 = vld [vmem:[%s4274_s7 + $0x1b8] sm:$0xff]  ;;  %v1333_v16 = vld [vmem:[%s4274_s7 + $0x30] sm:$0xff] }
 0x385   :  { %1013 = vmatmul.mubr.f32.vlgmr.msra.gmra.mxu1 %v922_v17  ;;  %v1366_v17 = vld [vmem:[%s4274_s7 + $0x138] sm:$0xff] }
 0x386   :  { %1083 = vmatprep.mubr.f32.mxu0 %v947_v18  ;;  %1162 = vmatprep.mubr.f32.mxu1 %v2619_v4  ;;  %v1348_v18 = vld [vmem:[%s4274_s7 + $0xa8] sm:$0xff] }
 0x387   :  { %1084 = vmatmul.mubr.f32.vlgmr.msra.gmra.mxu0 %v940_v19  ;;  %1123 = vmatpush1.msra.mxu1 %v914_v21  ;;  %v1381_v19 = vld [vmem:[%s4274_s7 + $0x1b0] sm:$0xff] }
 0x388   :  { %1124 = vmatprep.subr.mxu1 %v913_v22  ;;  %2347 = vmatpush3.msra.mxu0 %v1374_v47  ;;  %v1359_v47 = vld [vmem:[%s4274_s7 + $0x100] sm:$0xff] }
 0x389   :  { %1125 = vmatpush1.msra.mxu1 %v912_v23  ;;  %2348 = vmatprep.subr.mxu0 %v1389_v7 }
 0x38a   :  { %1126 = vmatprep.subr.mxu1 %v911_v24  ;;  %2349 = vmatpush3.msra.mxu0 %v1373_v13 }
 0x38b   :  { %1127 = vmatpush1.msra.mxu1 %v910_v25  ;;  %2350 = vmatprep.subr.mxu0 %v1388_v50 }
 0x38c   :  { %1128 = vmatprep.subr.mxu1 %v909_v26  ;;  %2351 = vmatpush3.msra.mxu0 %v1372_v52 }
 0x38d   :  { %1129 = vmatpush1.msra.mxu1 %v908_v27  ;;  %2352 = vmatprep.subr.mxu0 %v1387_v20 }
 0x38e   :  { %1196 = vmatprep.subr.mxu1 %v3436_v39  ;;  %2353 = vmatpush3.msra.mxu0 %v1371_v54 }
 0x38f   :  { %2354 = vmatprep.subr.mxu0 %v1386_v56 }
 0x390   :  { %2355 = vmatpush3.msra.mxu0 %v1370_v58 }
 0x391   :  { %2356 = vmatprep.subr.mxu0 %v1385_v60 }
 0x392   :  { %2357 = vmatpush3.msra.mxu0 %v1369_v62 }
 0x393   :  { %2358 = vmatprep.subr.mxu0 %v1384_v0 }
 0x394   :  { %2359 = vmatpush3.msra.mxu0 %v1368_v3  ;;  %v1421_v3 = vld [vmem:[%s4274_s7 + $0x2f0] sm:$0xff] }
 0x395   :  { %2360 = vmatprep.subr.mxu0 %v1383_v10  ;;  %v1405_v10 = vld [vmem:[%s4274_s7 + $0x270] sm:$0xff] }
 0x396   :  { %2361 = vmatpush3.msra.mxu0 %v1367_v12 }
 0x397   :  { %2362 = vmatprep.subr.mxu0 %v1382_v15  ;;  %v1420_v15 = vld [vmem:[%s4274_s7 + $0x2e8] sm:$0xff] }
 0x398   :  { %2363 = vmatpush3.msra.mxu0 %v1366_v17 }
 0x399   :  { %2364 = vmatprep.subr.mxu0 %v1381_v19  ;;  %v1437_v19 = vld [vmem:[%s4274_s7 + $0x370] sm:$0xff] }
 0x445   :  { %v2273_v28 = vpop.f32.mrf.mxu1 }
 0x447   :  { %v2274_v29 = vpop.f32.mrf.mxu1  ;;  %v2308_v31 = vpop.f32.mrf.mxu0 }
 0x448   :  { %v2275_v32 = vadd.f32 %v2274_v29, %v2273_v28  ;;  %v1379_v28 = vld [vmem:[%s4274_s7 + $0x1a0] sm:$0xff]  ;;  %v1330_v29 = vld [vmem:[%s4274_s7 + $0x18] sm:$0xff] }
 0x449   :  { %v2309_v33 = vpop.f32.mrf.mxu0 }
 0x44a   :  { %v1018_v34 = vmul.f32 0.0078125, %v2275_v32  ;;  %v2310_v35 = vadd.f32 %v2309_v33, %v2308_v31  ;;  %v1363_v31 = vld [vmem:[%s4274_s7 + $0x120] sm:$0xff]  ;;  %v1345_v32 = vld [vmem:[%s4274_s7 + $0x90] sm:$0xff]  ;;  %v1378_v33 = vld [vmem:[%s4274_s7 + $0x198] sm:$0xff] }
 0x44c   :  { %v1090_v36 = vmul.f32 %v1018_v34, %v1018_v34  ;;  %v1089_v37 = vmul.f32 0.0078125, %v2310_v35  ;;  %2168 = vmatmul.mubr.msk.f32.vlgmr.msra.gmra.mxu1 %vm1094_vm3, %v1018_v34  ;;  %v1329_v34 = vld [vmem:[%s4274_s7 + $0x10] sm:$0xff]  ;;  %v1362_v35 = vld [vmem:[%s4274_s7 + $0x118] sm:$0xff] }
 0x44d   :  { %1197 = vmatpush1.msra.mxu1 %v914_v21  ;;  %1236 = vmatprep.mubr.f32.mxu1 %v2619_v4  ;;  %v1342_v4 = vld [vmem:[%s4274_s7 + $0x78] sm:$0xff]  ;;  %v1332_v21 = vld [vmem:[%s4274_s7 + $0x28] sm:$0xff] }
 0x44e   :  { %v1091_v38 = vsub.f32 %v1089_v37, %v1090_v36  ;;  %1198 = vmatprep.subr.mxu1 %v913_v22  ;;  %v1365_v22 = vld [vmem:[%s4274_s7 + $0x130] sm:$0xff]  ;;  %v1344_v36 = vld [vmem:[%s4274_s7 + $0x88] sm:$0xff] }
 0x44f   :  { %1199 = vmatpush1.msra.mxu1 %v912_v23  ;;  %2365 = vmatpush3.msra.mxu0 %v1365_v22  ;;  %v1347_v23 = vld [vmem:[%s4274_s7 + $0xa0] sm:$0xff]  ;;  %v1377_v37 = vld [vmem:[%s4274_s7 + $0x190] sm:$0xff]  ;;  %v1452_v22 = vld [vmem:[%s4274_s7 + $0x3e8] sm:$0xff] }
 0x450   :  { %v1092_v40 = vadd.f32 1e-05, %v1091_v38  ;;  %1200 = vmatprep.subr.mxu1 %v911_v24  ;;  %v1380_v24 = vld [vmem:[%s4274_s7 + $0x1a8] sm:$0xff] }
 0x451   :  { %1201 = vmatpush1.msra.mxu1 %v910_v25  ;;  %2366 = vmatprep.subr.mxu0 %v1380_v24  ;;  %v1331_v25 = vld [vmem:[%s4274_s7 + $0x20] sm:$0xff]  ;;  %v1328_v38 = vld [vmem:[%s4274_s7 + $0x8] sm:$0xff] }
 0x452   :  { %2595 = vrsqrt.f32 %v1092_v40  ;;  %1202 = vmatprep.subr.mxu1 %v909_v26  ;;  %v1364_v26 = vld [vmem:[%s4274_s7 + $0x128] sm:$0xff]  ;;  %v1361_v40 = vld [vmem:[%s4274_s7 + $0x110] sm:$0xff] }
 0x453   :  { %1203 = vmatpush1.msra.mxu1 %v908_v27  ;;  %2367 = vmatpush3.msra.mxu0 %v1364_v26  ;;  %v1346_v27 = vld [vmem:[%s4274_s7 + $0x98] sm:$0xff]  ;;  %v1436_v24 = vld [vmem:[%s4274_s7 + $0x368] sm:$0xff]  ;;  %v1451_v26 = vld [vmem:[%s4274_s7 + $0x3e0] sm:$0xff] }
 0x454   :  { %2311 = vmatprep.subr.mxu1 %v1358_v41  ;;  %2368 = vmatprep.subr.mxu0 %v1379_v28  ;;  %v1376_v41 = vld [vmem:[%s4274_s7 + $0x188] sm:$0xff]  ;;  %v1435_v28 = vld [vmem:[%s4274_s7 + $0x360] sm:$0xff] }
 0x455   :  { %2369 = vmatpush3.msra.mxu0 %v1363_v31  ;;  %v1450_v31 = vld [vmem:[%s4274_s7 + $0x3d8] sm:$0xff] }
 0x456   :  { %2370 = vmatprep.subr.mxu0 %v1378_v33  ;;  %v1434_v33 = vld [vmem:[%s4274_s7 + $0x358] sm:$0xff] }
 0x457   :  { %2371 = vmatpush3.msra.mxu0 %v1362_v35  ;;  %v1449_v35 = vld [vmem:[%s4274_s7 + $0x3d0] sm:$0xff] }
 0x458   :  { %2372 = vmatprep.subr.mxu0 %v1377_v37  ;;  %v1433_v37 = vld [vmem:[%s4274_s7 + $0x350] sm:$0xff] }
 0x459   :  { %2373 = vmatpush3.msra.mxu0 %v1361_v40  ;;  %v1448_v40 = vld [vmem:[%s4274_s7 + $0x3c8] sm:$0xff] }
 0x45a   :  { %2374 = vmatprep.subr.mxu0 %v1376_v41  ;;  %v1432_v41 = vld [vmem:[%s4274_s7 + $0x348] sm:$0xff] }
 0x45f   :  { %v2596_v39 = vpop.eup %2595 }
 0x460   :  { %2169 = vmatmul.mubr.msk.f32.vlgmr.msra.gmra.mxu1 %vm1094_vm3, %v2596_v39  ;;  %v1343_v39 = vld [vmem:[%s4274_s7 + $0x80] sm:$0xff] }
 0x461   :  { %2312 = vmatpush3.msra.mxu1 %v1342_v4  ;;  %v1327_v4 = vld [vmem:[%s4274_s7] sm:$0xff] }
 0x462   :  { %2313 = vmatprep.subr.mxu1 %v1357_v42  ;;  %v1360_v42 = vld [vmem:[%s4274_s7 + $0x108] sm:$0xff] }
 0x463   :  { %2314 = vmatpush3.msra.mxu1 %v1341_v44  ;;  %2375 = vmatpush3.msra.mxu0 %v1360_v42  ;;  %v1422_v44 = vld [vmem:[%s4274_s7 + $0x2f8] sm:$0xff]  ;;  %v1447_v42 = vld [vmem:[%s4274_s7 + $0x3c0] sm:$0xff] }
 0x464   :  { %2315 = vmatprep.subr.mxu1 %v1356_v48  ;;  %2376 = vmatprep.subr.mxu0 %v1375_v43  ;;  %v1454_v48 = vld [vmem:[%s4274_s7 + $0x3f8] sm:$0xff] }
 0x465   :  { %2316 = vmatpush3.msra.mxu1 %v1340_v49  ;;  %2377 = vmatpush3.msra.mxu0 %v1359_v47  ;;  %v1398_v43 = vld [vmem:[%s4274_s7 + $0x238] sm:$0xff]  ;;  %v1413_v47 = vld [vmem:[%s4274_s7 + $0x2b0] sm:$0xff] }
 0x466   :  { %2317 = vmatprep.subr.mxu1 %v1355_v51  ;;  %2416 = vmatprep.subr.mxu0 %v1454_v48  ;;  %v1446_v48 = vld [vmem:[%s4274_s7 + $0x3b8] sm:$0xff] }
 0x467   :  { %2318 = vmatpush3.msra.mxu1 %v1339_v9 }
 0x468   :  { %2319 = vmatprep.subr.mxu1 %v1354_v53 }
 0x469   :  { %2320 = vmatpush3.msra.mxu1 %v1338_v55 }
 0x46a   :  { %2321 = vmatprep.subr.mxu1 %v1353_v57 }
 0x46b   :  { %2322 = vmatpush3.msra.mxu1 %v1337_v59 }
 0x46c   :  { %2323 = vmatprep.subr.mxu1 %v1352_v61 }
 0x46d   :  { %2324 = vmatpush3.msra.mxu1 %v1336_v63 }
 0x46e   :  { %2325 = vmatprep.subr.mxu1 %v1351_v1 }
 0x46f   :  { %2326 = vmatpush3.msra.mxu1 %v1335_v2 }
 0x470   :  { %2327 = vmatprep.subr.mxu1 %v1350_v8 }
 0x471   :  { %2328 = vmatpush3.msra.mxu1 %v1334_v11 }
 0x472   :  { %2329 = vmatprep.subr.mxu1 %v1349_v14  ;;  %v1438_v14 = vld [vmem:[%s4274_s7 + $0x378] sm:$0xff] }
 0x473   :  { %2330 = vmatpush3.msra.mxu1 %v1333_v16  ;;  %v1453_v16 = vld [vmem:[%s4274_s7 + $0x3f0] sm:$0xff] }
 0x474   :  { %2331 = vmatprep.subr.mxu1 %v1348_v18  ;;  %v1404_v18 = vld [vmem:[%s4274_s7 + $0x268] sm:$0xff] }
 0x475   :  { %2332 = vmatpush3.msra.mxu1 %v1332_v21  ;;  %v1419_v21 = vld [vmem:[%s4274_s7 + $0x2e0] sm:$0xff] }
 0x476   :  { %2333 = vmatprep.subr.mxu1 %v1347_v23  ;;  %v1403_v23 = vld [vmem:[%s4274_s7 + $0x260] sm:$0xff] }
 0x477   :  { %2334 = vmatpush3.msra.mxu1 %v1331_v25  ;;  %v1418_v25 = vld [vmem:[%s4274_s7 + $0x2d8] sm:$0xff] }
 0x478   :  { %2335 = vmatprep.subr.mxu1 %v1346_v27  ;;  %v1402_v27 = vld [vmem:[%s4274_s7 + $0x258] sm:$0xff] }
 0x479   :  { %2336 = vmatpush3.msra.mxu1 %v1330_v29  ;;  %v1417_v29 = vld [vmem:[%s4274_s7 + $0x2d0] sm:$0xff] }
 0x47a   :  { %2337 = vmatprep.subr.mxu1 %v1345_v32  ;;  %v1401_v32 = vld [vmem:[%s4274_s7 + $0x250] sm:$0xff] }
 0x47b   :  { %2338 = vmatpush3.msra.mxu1 %v1329_v34  ;;  %v1416_v34 = vld [vmem:[%s4274_s7 + $0x2c8] sm:$0xff] }
 0x47c   :  { %2339 = vmatprep.subr.mxu1 %v1344_v36  ;;  %v1400_v36 = vld [vmem:[%s4274_s7 + $0x248] sm:$0xff] }
 0x47d   :  { %2340 = vmatpush3.msra.mxu1 %v1328_v38  ;;  %v1415_v38 = vld [vmem:[%s4274_s7 + $0x2c0] sm:$0xff] }
 0x47e   :  { %2341 = vmatprep.subr.mxu1 %v1343_v39  ;;  %v1399_v39 = vld [vmem:[%s4274_s7 + $0x240] sm:$0xff] }
 0x47f   :  { %2342 = vmatpush3.msra.mxu1 %v1327_v4  ;;  %v1414_v4 = vld [vmem:[%s4274_s7 + $0x2b8] sm:$0xff] }
 0x480   :  { %2381 = vmatprep.subr.mxu1 %v1422_v44  ;;  %v1431_v44 = vld [vmem:[%s4274_s7 + $0x340] sm:$0xff] }
 0x50c   :  { %v1164_v7 = vpop.f32.mrf.mxu1 }
 0x50d   :  { %v1246_v13 = vrot.slane %v1164_v7, %v3324_v30  ;;  %v1397_v7 = vld [vmem:[%s4274_s7 + $0x230] sm:$0xff] }
 0x50e   :  { %v1166_v49 = vpop.f32.mrf.mxu1 }
 0x50f   :  { %v1250_v50 = vrot.slane %v1166_v49, %v3324_v30  ;;  %v1251_v52 = vsub.f32 %v3439_v45, %v1246_v13  ;;  %v1253_v9 = vsub.f32 %v3443_v5, %v1246_v13  ;;  %v1430_v49 = vld [vmem:[%s4274_s7 + $0x338] sm:$0xff]  ;;  %v1412_v13 = vld [vmem:[%s4274_s7 + $0x2a8] sm:$0xff] }
 0x511   :  { %v1252_v53 = vsub.f32 %v3441_v46, %v1250_v50  ;;  %v1254_v55 = vsub.f32 %v3451_v6, %v1250_v50  ;;  %v1406_v46 = vld [vmem:[%s4274_s7 + $0x278] sm:$0xff]  ;;  %v1445_v50 = vld [vmem:[%s4274_s7 + $0x3b0] sm:$0xff] }
 0x520   :  { %v1238_v51 = vpop.f32.mrf.mxu1 }
 0x521   :  { %v1258_v20 = vrot.slane %v1238_v51, %v3324_v30  ;;  %v1396_v51 = vld [vmem:[%s4274_s7 + $0x228] sm:$0xff] }
 0x522   :  { %v1240_v54 = vpop.f32.mrf.mxu1 }
 0x523   :  { %v1263_v56 = vmul.f32 %v1258_v20, %v1251_v52  ;;  %v1265_v57 = vmul.f32 %v1258_v20, %v1253_v9  ;;  %v1262_v58 = vrot.slane %v1240_v54, %v3324_v30  ;;  %v1429_v52 = vld [vmem:[%s4274_s7 + $0x330] sm:$0xff]  ;;  %v1411_v9 = vld [vmem:[%s4274_s7 + $0x2a0] sm:$0xff]  ;;  %v1444_v20 = vld [vmem:[%s4274_s7 + $0x3a8] sm:$0xff] }
 0x524   :  { %v1428_v54 = vld [vmem:[%s4274_s7 + $0x328] sm:$0xff] }
 0x525   :  { %v1267_v59 = vmax.f32 %v1263_v56, 0.0  ;;  %v1269_v60 = vmax.f32 %v1265_v57, 0.0  ;;  %v1264_v61 = vmul.f32 %v1262_v58, %v1252_v53  ;;  %v1266_v62 = vmul.f32 %v1262_v58, %v1254_v55  ;;  %v1395_v53 = vld [vmem:[%s4274_s7 + $0x220] sm:$0xff]  ;;  %v1410_v55 = vld [vmem:[%s4274_s7 + $0x298] sm:$0xff] }
 0x526   :  { %v1443_v56 = vld [vmem:[%s4274_s7 + $0x3a0] sm:$0xff]  ;;  %v1394_v57 = vld [vmem:[%s4274_s7 + $0x218] sm:$0xff] }
 0x527   :  { %1271 = vst [vmem:[#allocation3] sm:$0xff] %v1267_v59  ;;  %1273 = vst [vmem:[#allocation3 + $0x10] sm:$0xff] %v1269_v60  ;;  %v1268_v45 = vmax.f32 %v1264_v61, 0.0  ;;  %v1270_v63 = vmax.f32 %v1266_v62, 0.0  ;;  %v1427_v58 = vld [vmem:[%s4274_s7 + $0x320] sm:$0xff]  ;;  %v1409_v59 = vld [vmem:[%s4274_s7 + $0x290] sm:$0xff] }
 0x528   :  { %v1442_v60 = vld [vmem:[%s4274_s7 + $0x398] sm:$0xff]  ;;  %v1393_v61 = vld [vmem:[%s4274_s7 + $0x210] sm:$0xff] }
 0x529   :  { %1272 = vst [vmem:[#allocation3 + $0x8] sm:$0xff] %v1268_v45  ;;  %1274 = vst [vmem:[#allocation3 + $0x18] sm:$0xff] %v1270_v63  ;;  %v1426_v62 = vld [vmem:[%s4274_s7 + $0x318] sm:$0xff]  ;;  %v1408_v45 = vld [vmem:[%s4274_s7 + $0x288] sm:$0xff] }
 0x52a   :  { %v1441_v63 = vld [vmem:[%s4274_s7 + $0x390] sm:$0xff] }
 0x52e   :  { %v1277_v5 = vld [vmem:[#allocation3] sm:$0xc]  ;;  %v1275_v30 = vld [vmem:[#allocation3] sm:$0x3] }
 0x52f   :  { %v1293_v12 = vrot.slane %v1277_v5, 2  ;;  %v1425_v5 = vld [vmem:[%s4274_s7 + $0x310] sm:$0xff] }
 0x530   :  { %v1276_v6 = vld [vmem:[#allocation3 + $0x8] sm:$0x3]  ;;  %v1278_v0 = vld [vmem:[#allocation3 + $0x8] sm:$0xc]  ;;  %v1280_v1 = vld [vmem:[#allocation3 + $0x8] sm:$0x30] }
 0x531   :  { %1654 = vmatprep.mubr.f32.mxu1 %v1276_v6  ;;  %v1294_v2 = vrot.slane %v1278_v0, 2  ;;  %v1300_v8 = vrot.slane %v1280_v1, 4  ;;  %v1282_v11 = vld [vmem:[#allocation3 + $0x8] sm:$0xc0]  ;;  %v1407_v6 = vld [vmem:[%s4274_s7 + $0x280] sm:$0xff]  ;;  %v1440_v0 = vld [vmem:[%s4274_s7 + $0x388] sm:$0xff] }
 0x532   :  { %1655 = vmatmul.mubr.f32.vlgmr.msra.gmra.mxu1 %v1275_v30  ;;  %v1306_v17 = vrot.slane %v1282_v11, 6  ;;  %v1279_v1 = vld [vmem:[#allocation3] sm:$0x30]  ;;  %v1391_v30 = vld [vmem:[%s4274_s7 + $0x200] sm:$0xff] }
 0x533   :  { %2382 = vmatpush3.msra.mxu1 %v1406_v46  ;;  %1724 = vmatprep.mubr.f32.mxu0 %v1294_v2  ;;  %v1392_v46 = vld [vmem:[%s4274_s7 + $0x208] sm:$0xff]  ;;  %v1423_v11 = vld [vmem:[%s4274_s7 + $0x300] sm:$0xff] }
 0x534   :  { %2383 = vmatprep.subr.mxu1 %v1421_v3  ;;  %1794 = vmatprep.mubr.f32.mxu1 %v1300_v8  ;;  %v1424_v2 = vld [vmem:[%s4274_s7 + $0x308] sm:$0xff]  ;;  %v1439_v3 = vld [vmem:[%s4274_s7 + $0x380] sm:$0xff]  ;;  %v1299_v8 = vrot.slane %v1279_v1, 4  ;;  %v1490_v1 = vld [vmem:[%s4274_s7 + $0x518] sm:$0xff] }
 0x535   :  { %1725 = vmatmul.mubr.f32.vlgmr.msra.gmra.mxu0 %v1293_v12  ;;  %2384 = vmatpush3.msra.mxu1 %v1405_v10  ;;  %v1486_v10 = vld [vmem:[%s4274_s7 + $0x4f8] sm:$0xff]  ;;  %v1281_v12 = vld [vmem:[#allocation3] sm:$0xc0] }
 0x536   :  { %2417 = vmatpush3.msra.mxu0 %v1438_v14  ;;  %2385 = vmatprep.subr.mxu1 %v1420_v15  ;;  %v1470_v14 = vld [vmem:[%s4274_s7 + $0x478] sm:$0xff]  ;;  %v1485_v15 = vld [vmem:[%s4274_s7 + $0x4f0] sm:$0xff] }
 0x537   :  { %2418 = vmatprep.subr.mxu0 %v1453_v16  ;;  %1864 = vmatprep.mubr.f32.mxu0 %v1306_v17  ;;  %v1286_v16 = vld [vmem:[#allocation3 + $0x18] sm:$0xc]  ;;  %v1284_v17 = vld [vmem:[#allocation3 + $0x18] sm:$0x3] }
 0x538   :  { %2386 = vmatpush3.msra.mxu1 %v1404_v18  ;;  %2419 = vmatpush3.msra.mxu0 %v1437_v19  ;;  %v1305_v18 = vrot.slane %v1281_v12, 6  ;;  %v1518_v19 = vld [vmem:[%s4274_s7 + $0x5f8] sm:$0xff]  ;;  %v1455_v12 = vld [vmem:[%s4274_s7 + $0x400] sm:$0xff] }
 0x539   :  { %2387 = vmatprep.subr.mxu1 %v1419_v21  ;;  %2420 = vmatprep.subr.mxu0 %v1452_v22  ;;  %v1469_v21 = vld [vmem:[%s4274_s7 + $0x470] sm:$0xff]  ;;  %v1502_v22 = vld [vmem:[%s4274_s7 + $0x578] sm:$0xff] }
 0x53a   :  { %2388 = vmatpush3.msra.mxu1 %v1403_v23  ;;  %2421 = vmatpush3.msra.mxu0 %v1436_v24  ;;  %v1312_v23 = vrot.slane %v1286_v16, 2  ;;  %v1484_v24 = vld [vmem:[%s4274_s7 + $0x4e8] sm:$0xff] }
 0x53b   :  { %2389 = vmatprep.subr.mxu1 %v1418_v25  ;;  %2422 = vmatprep.subr.mxu0 %v1451_v26  ;;  %v1517_v25 = vld [vmem:[%s4274_s7 + $0x5f0] sm:$0xff]  ;;  %v1468_v26 = vld [vmem:[%s4274_s7 + $0x468] sm:$0xff] }
 0x53c   :  { %2390 = vmatpush3.msra.mxu1 %v1402_v27  ;;  %2423 = vmatpush3.msra.mxu0 %v1435_v28  ;;  %v1501_v27 = vld [vmem:[%s4274_s7 + $0x570] sm:$0xff]  ;;  %v1483_v28 = vld [vmem:[%s4274_s7 + $0x4e0] sm:$0xff]  ;;  %v1288_v16 = vld [vmem:[#allocation3 + $0x18] sm:$0x30] }
 0x53d   :  { %2391 = vmatprep.subr.mxu1 %v1417_v29  ;;  %2424 = vmatprep.subr.mxu0 %v1450_v31  ;;  %v1516_v29 = vld [vmem:[%s4274_s7 + $0x5e8] sm:$0xff]  ;;  %v1467_v31 = vld [vmem:[%s4274_s7 + $0x460] sm:$0xff] }
 0x53e   :  { %2392 = vmatpush3.msra.mxu1 %v1401_v32  ;;  %2425 = vmatpush3.msra.mxu0 %v1434_v33  ;;  %v1500_v32 = vld [vmem:[%s4274_s7 + $0x568] sm:$0xff]  ;;  %v1482_v33 = vld [vmem:[%s4274_s7 + $0x4d8] sm:$0xff] }
 0x53f   :  { %2393 = vmatprep.subr.mxu1 %v1416_v34  ;;  %2426 = vmatprep.subr.mxu0 %v1449_v35  ;;  %v1515_v34 = vld [vmem:[%s4274_s7 + $0x5e0] sm:$0xff]  ;;  %v1466_v35 = vld [vmem:[%s4274_s7 + $0x458] sm:$0xff] }
 0x540   :  { %2394 = vmatpush3.msra.mxu1 %v1400_v36  ;;  %2427 = vmatpush3.msra.mxu0 %v1433_v37  ;;  %v1499_v36 = vld [vmem:[%s4274_s7 + $0x560] sm:$0xff]  ;;  %v1481_v37 = vld [vmem:[%s4274_s7 + $0x4d0] sm:$0xff] }
 0x541   :  { %2395 = vmatprep.subr.mxu1 %v1415_v38  ;;  %2428 = vmatprep.subr.mxu0 %v1448_v40  ;;  %v1514_v38 = vld [vmem:[%s4274_s7 + $0x5d8] sm:$0xff]  ;;  %v1465_v40 = vld [vmem:[%s4274_s7 + $0x450] sm:$0xff] }
 0x542   :  { %2396 = vmatpush3.msra.mxu1 %v1399_v39  ;;  %2429 = vmatpush3.msra.mxu0 %v1432_v41  ;;  %v1498_v39 = vld [vmem:[%s4274_s7 + $0x558] sm:$0xff]  ;;  %v1480_v41 = vld [vmem:[%s4274_s7 + $0x4c8] sm:$0xff] }
 0x543   :  { %2397 = vmatprep.subr.mxu1 %v1414_v4  ;;  %2430 = vmatprep.subr.mxu0 %v1447_v42  ;;  %v1513_v4 = vld [vmem:[%s4274_s7 + $0x5d0] sm:$0xff]  ;;  %v1464_v42 = vld [vmem:[%s4274_s7 + $0x448] sm:$0xff] }
 0x544   :  { %2398 = vmatpush3.msra.mxu1 %v1398_v43  ;;  %2431 = vmatpush3.msra.mxu0 %v1431_v44  ;;  %v1497_v43 = vld [vmem:[%s4274_s7 + $0x550] sm:$0xff]  ;;  %v1479_v44 = vld [vmem:[%s4274_s7 + $0x4c0] sm:$0xff] }
 0x545   :  { %2399 = vmatprep.subr.mxu1 %v1413_v47  ;;  %2432 = vmatprep.subr.mxu0 %v1446_v48  ;;  %v1512_v47 = vld [vmem:[%s4274_s7 + $0x5c8] sm:$0xff]  ;;  %v1463_v48 = vld [vmem:[%s4274_s7 + $0x440] sm:$0xff] }
 0x546   :  { %2400 = vmatpush3.msra.mxu1 %v1397_v7  ;;  %2433 = vmatpush3.msra.mxu0 %v1430_v49  ;;  %v1496_v7 = vld [vmem:[%s4274_s7 + $0x548] sm:$0xff]  ;;  %v1478_v49 = vld [vmem:[%s4274_s7 + $0x4b8] sm:$0xff] }
 0x547   :  { %2401 = vmatprep.subr.mxu1 %v1412_v13  ;;  %2434 = vmatprep.subr.mxu0 %v1445_v50  ;;  %v1511_v13 = vld [vmem:[%s4274_s7 + $0x5c0] sm:$0xff]  ;;  %v1462_v50 = vld [vmem:[%s4274_s7 + $0x438] sm:$0xff] }
 0x548   :  { %2402 = vmatpush3.msra.mxu1 %v1396_v51  ;;  %2435 = vmatpush3.msra.mxu0 %v1429_v52  ;;  %v1495_v51 = vld [vmem:[%s4274_s7 + $0x540] sm:$0xff]  ;;  %v1477_v52 = vld [vmem:[%s4274_s7 + $0x4b0] sm:$0xff] }
 0x549   :  { %2403 = vmatprep.subr.mxu1 %v1411_v9  ;;  %2436 = vmatprep.subr.mxu0 %v1444_v20  ;;  %v1510_v9 = vld [vmem:[%s4274_s7 + $0x5b8] sm:$0xff]  ;;  %v1461_v20 = vld [vmem:[%s4274_s7 + $0x430] sm:$0xff] }
 0x54a   :  { %2404 = vmatpush3.msra.mxu1 %v1395_v53  ;;  %2437 = vmatpush3.msra.mxu0 %v1428_v54  ;;  %v1494_v53 = vld [vmem:[%s4274_s7 + $0x538] sm:$0xff]  ;;  %v1476_v54 = vld [vmem:[%s4274_s7 + $0x4a8] sm:$0xff] }
 0x54b   :  { %2405 = vmatprep.subr.mxu1 %v1410_v55  ;;  %2438 = vmatprep.subr.mxu0 %v1443_v56  ;;  %v1509_v55 = vld [vmem:[%s4274_s7 + $0x5b0] sm:$0xff]  ;;  %v1460_v56 = vld [vmem:[%s4274_s7 + $0x428] sm:$0xff] }
 0x54c   :  { %2406 = vmatpush3.msra.mxu1 %v1394_v57  ;;  %2439 = vmatpush3.msra.mxu0 %v1427_v58  ;;  %v1493_v57 = vld [vmem:[%s4274_s7 + $0x530] sm:$0xff]  ;;  %v1475_v58 = vld [vmem:[%s4274_s7 + $0x4a0] sm:$0xff] }
 0x54d   :  { %2407 = vmatprep.subr.mxu1 %v1409_v59  ;;  %2440 = vmatprep.subr.mxu0 %v1442_v60  ;;  %v1508_v59 = vld [vmem:[%s4274_s7 + $0x5a8] sm:$0xff]  ;;  %v1459_v60 = vld [vmem:[%s4274_s7 + $0x420] sm:$0xff] }
 0x54e   :  { %2408 = vmatpush3.msra.mxu1 %v1393_v61  ;;  %2441 = vmatpush3.msra.mxu0 %v1426_v62  ;;  %v1492_v61 = vld [vmem:[%s4274_s7 + $0x528] sm:$0xff]  ;;  %v1474_v62 = vld [vmem:[%s4274_s7 + $0x498] sm:$0xff] }
 0x54f   :  { %2409 = vmatprep.subr.mxu1 %v1408_v45  ;;  %2442 = vmatprep.subr.mxu0 %v1441_v63  ;;  %v1507_v45 = vld [vmem:[%s4274_s7 + $0x5a0] sm:$0xff]  ;;  %v1458_v63 = vld [vmem:[%s4274_s7 + $0x418] sm:$0xff] }
 0x550   :  { %2410 = vmatpush3.msra.mxu1 %v1392_v46  ;;  %2443 = vmatpush3.msra.mxu0 %v1425_v5  ;;  %v1491_v46 = vld [vmem:[%s4274_s7 + $0x520] sm:$0xff]  ;;  %v1473_v5 = vld [vmem:[%s4274_s7 + $0x490] sm:$0xff] }
 0x551   :  { %2411 = vmatprep.subr.mxu1 %v1407_v6  ;;  %2444 = vmatprep.subr.mxu0 %v1440_v0  ;;  %v1506_v6 = vld [vmem:[%s4274_s7 + $0x598] sm:$0xff]  ;;  %v1457_v0 = vld [vmem:[%s4274_s7 + $0x410] sm:$0xff] }
 0x552   :  { %2412 = vmatpush3.msra.mxu1 %v1391_v30  ;;  %2445 = vmatpush3.msra.mxu0 %v1424_v2  ;;  %v1472_v30 = vld [vmem:[%s4274_s7 + $0x488] sm:$0xff]  ;;  %v1505_v2 = vld [vmem:[%s4274_s7 + $0x590] sm:$0xff] }
 0x553   :  { %1795 = vmatmul.mubr.f32.vlgmr.msra.gmra.mxu1 %v1299_v8  ;;  %2446 = vmatprep.subr.mxu0 %v1439_v3  ;;  %v1456_v3 = vld [vmem:[%s4274_s7 + $0x408] sm:$0xff]  ;;  %v1489_v8 = vld [vmem:[%s4274_s7 + $0x510] sm:$0xff] }
 0x554   :  { %2451 = vmatprep.subr.mxu1 %v1486_v10  ;;  %2447 = vmatpush3.msra.mxu0 %v1423_v11  ;;  %v1471_v10 = vld [vmem:[%s4274_s7 + $0x480] sm:$0xff]  ;;  %v1504_v11 = vld [vmem:[%s4274_s7 + $0x588] sm:$0xff] }
 0x555   :  { %2452 = vmatpush3.msra.mxu1 %v1470_v14  ;;  %1934 = vmatprep.mubr.f32.mxu1 %v1284_v17  ;;  %v1488_v14 = vld [vmem:[%s4274_s7 + $0x508] sm:$0xff]  ;;  %v1550_v17 = vld [vmem:[%s4274_s7 + $0x6f8] sm:$0xff] }
 0x556   :  { %1865 = vmatmul.mubr.f32.vlgmr.msra.gmra.mxu0 %v1305_v18  ;;  %2453 = vmatprep.subr.mxu1 %v1485_v15  ;;  %v1503_v15 = vld [vmem:[%s4274_s7 + $0x580] sm:$0xff] }
 0x557   :  { %2486 = vmatprep.subr.mxu0 %v1518_v19  ;;  %2454 = vmatpush3.msra.mxu1 %v1469_v21  ;;  %v1487_v18 = vld [vmem:[%s4274_s7 + $0x500] sm:$0xff] }
 0x558   :  { %2487 = vmatpush3.msra.mxu0 %v1502_v22  ;;  %2004 = vmatprep.mubr.f32.mxu0 %v1312_v23  ;;  %v1285_v19 = vld [vmem:[#allocation3 + $0x10] sm:$0xc]  ;;  %v1283_v21 = vld [vmem:[#allocation3 + $0x10] sm:$0x3]  ;;  %v1534_v22 = vld [vmem:[%s4274_s7 + $0x678] sm:$0xff]  ;;  %v1318_v23 = vrot.slane %v1288_v16, 4 }
 0x559   :  { %2455 = vmatprep.subr.mxu1 %v1484_v24  ;;  %2488 = vmatprep.subr.mxu0 %v1517_v25  ;;  %v1549_v24 = vld [vmem:[%s4274_s7 + $0x6f0] sm:$0xff]  ;;  %v1290_v25 = vld [vmem:[#allocation3 + $0x18] sm:$0xc0] }
 0x55a   :  { %2456 = vmatpush3.msra.mxu1 %v1468_v26  ;;  %2489 = vmatpush3.msra.mxu0 %v1501_v27  ;;  %v1311_v26 = vrot.slane %v1285_v19, 2  ;;  %v1582_v27 = vld [vmem:[%s4274_s7 + $0x7f8] sm:$0xff]  ;;  %v1520_v16 = vld [vmem:[%s4274_s7 + $0x608] sm:$0xff] }
 0x55b   :  { %2457 = vmatprep.subr.mxu1 %v1483_v28  ;;  %2490 = vmatprep.subr.mxu0 %v1516_v29  ;;  %v1533_v28 = vld [vmem:[%s4274_s7 + $0x670] sm:$0xff]  ;;  %v1566_v29 = vld [vmem:[%s4274_s7 + $0x778] sm:$0xff]  ;;  %v1568_v19 = vld [vmem:[%s4274_s7 + $0x788] sm:$0xff] }
 0x55c   :  { %2458 = vmatpush3.msra.mxu1 %v1467_v31  ;;  %2491 = vmatpush3.msra.mxu0 %v1500_v32  ;;  %v1324_v31 = vrot.slane %v1290_v25, 6  ;;  %v1548_v32 = vld [vmem:[%s4274_s7 + $0x6e8] sm:$0xff]  ;;  %v1289_v25 = vld [vmem:[#allocation3 + $0x10] sm:$0xc0] }
 0x55d   :  { %2459 = vmatprep.subr.mxu1 %v1482_v33  ;;  %2492 = vmatprep.subr.mxu0 %v1515_v34  ;;  %v1581_v33 = vld [vmem:[%s4274_s7 + $0x7f0] sm:$0xff]  ;;  %v1532_v34 = vld [vmem:[%s4274_s7 + $0x668] sm:$0xff] }
 0x55e   :  { %2460 = vmatpush3.msra.mxu1 %v1466_v35  ;;  %2493 = vmatpush3.msra.mxu0 %v1499_v36  ;;  %v1565_v35 = vld [vmem:[%s4274_s7 + $0x770] sm:$0xff]  ;;  %v1547_v36 = vld [vmem:[%s4274_s7 + $0x6e0] sm:$0xff] }
 0x55f   :  { %2461 = vmatprep.subr.mxu1 %v1481_v37  ;;  %2494 = vmatprep.subr.mxu0 %v1514_v38  ;;  %v1580_v37 = vld [vmem:[%s4274_s7 + $0x7e8] sm:$0xff]  ;;  %v1531_v38 = vld [vmem:[%s4274_s7 + $0x660] sm:$0xff] }
 0x560   :  { %2462 = vmatpush3.msra.mxu1 %v1465_v40  ;;  %2495 = vmatpush3.msra.mxu0 %v1498_v39  ;;  %v1564_v40 = vld [vmem:[%s4274_s7 + $0x768] sm:$0xff]  ;;  %v1546_v39 = vld [vmem:[%s4274_s7 + $0x6d8] sm:$0xff] }
 0x561   :  { %2463 = vmatprep.subr.mxu1 %v1480_v41  ;;  %2496 = vmatprep.subr.mxu0 %v1513_v4  ;;  %v1579_v41 = vld [vmem:[%s4274_s7 + $0x7e0] sm:$0xff]  ;;  %v1530_v4 = vld [vmem:[%s4274_s7 + $0x658] sm:$0xff] }
 0x562   :  { %2464 = vmatpush3.msra.mxu1 %v1464_v42  ;;  %2497 = vmatpush3.msra.mxu0 %v1497_v43  ;;  %v1563_v42 = vld [vmem:[%s4274_s7 + $0x760] sm:$0xff]  ;;  %v1545_v43 = vld [vmem:[%s4274_s7 + $0x6d0] sm:$0xff] }
 0x563   :  { %2465 = vmatprep.subr.mxu1 %v1479_v44  ;;  %2498 = vmatprep.subr.mxu0 %v1512_v47  ;;  %v1578_v44 = vld [vmem:[%s4274_s7 + $0x7d8] sm:$0xff]  ;;  %v1529_v47 = vld [vmem:[%s4274_s7 + $0x650] sm:$0xff] }
 0x564   :  { %2466 = vmatpush3.msra.mxu1 %v1463_v48  ;;  %2499 = vmatpush3.msra.mxu0 %v1496_v7  ;;  %v1562_v48 = vld [vmem:[%s4274_s7 + $0x758] sm:$0xff]  ;;  %v1544_v7 = vld [vmem:[%s4274_s7 + $0x6c8] sm:$0xff] }
 0x565   :  { %2467 = vmatprep.subr.mxu1 %v1478_v49  ;;  %2500 = vmatprep.subr.mxu0 %v1511_v13  ;;  %v1577_v49 = vld [vmem:[%s4274_s7 + $0x7d0] sm:$0xff]  ;;  %v1528_v13 = vld [vmem:[%s4274_s7 + $0x648] sm:$0xff] }
 0x566   :  { %2468 = vmatpush3.msra.mxu1 %v1462_v50  ;;  %2501 = vmatpush3.msra.mxu0 %v1495_v51  ;;  %v1561_v50 = vld [vmem:[%s4274_s7 + $0x750] sm:$0xff]  ;;  %v1543_v51 = vld [vmem:[%s4274_s7 + $0x6c0] sm:$0xff] }
 0x567   :  { %2469 = vmatprep.subr.mxu1 %v1477_v52  ;;  %2502 = vmatprep.subr.mxu0 %v1510_v9  ;;  %v1576_v52 = vld [vmem:[%s4274_s7 + $0x7c8] sm:$0xff]  ;;  %v1527_v9 = vld [vmem:[%s4274_s7 + $0x640] sm:$0xff] }
 0x568   :  { %2470 = vmatpush3.msra.mxu1 %v1461_v20  ;;  %2503 = vmatpush3.msra.mxu0 %v1494_v53  ;;  %v1560_v20 = vld [vmem:[%s4274_s7 + $0x748] sm:$0xff]  ;;  %v1542_v53 = vld [vmem:[%s4274_s7 + $0x6b8] sm:$0xff] }
 0x569   :  { %2471 = vmatprep.subr.mxu1 %v1476_v54  ;;  %2504 = vmatprep.subr.mxu0 %v1509_v55  ;;  %v1575_v54 = vld [vmem:[%s4274_s7 + $0x7c0] sm:$0xff]  ;;  %v1526_v55 = vld [vmem:[%s4274_s7 + $0x638] sm:$0xff] }
 0x56a   :  { %2472 = vmatpush3.msra.mxu1 %v1460_v56  ;;  %2505 = vmatpush3.msra.mxu0 %v1493_v57  ;;  %v1559_v56 = vld [vmem:[%s4274_s7 + $0x740] sm:$0xff]  ;;  %v1541_v57 = vld [vmem:[%s4274_s7 + $0x6b0] sm:$0xff] }
 0x56b   :  { %2473 = vmatprep.subr.mxu1 %v1475_v58  ;;  %2506 = vmatprep.subr.mxu0 %v1508_v59  ;;  %v1574_v58 = vld [vmem:[%s4274_s7 + $0x7b8] sm:$0xff]  ;;  %v1525_v59 = vld [vmem:[%s4274_s7 + $0x630] sm:$0xff] }
 0x56c   :  { %2474 = vmatpush3.msra.mxu1 %v1459_v60  ;;  %2507 = vmatpush3.msra.mxu0 %v1492_v61  ;;  %v1558_v60 = vld [vmem:[%s4274_s7 + $0x738] sm:$0xff]  ;;  %v1540_v61 = vld [vmem:[%s4274_s7 + $0x6a8] sm:$0xff] }
 0x56d   :  { %2475 = vmatprep.subr.mxu1 %v1474_v62  ;;  %2508 = vmatprep.subr.mxu0 %v1507_v45  ;;  %v1573_v62 = vld [vmem:[%s4274_s7 + $0x7b0] sm:$0xff]  ;;  %v1524_v45 = vld [vmem:[%s4274_s7 + $0x628] sm:$0xff] }
 0x56e   :  { %2476 = vmatpush3.msra.mxu1 %v1458_v63  ;;  %2509 = vmatpush3.msra.mxu0 %v1491_v46  ;;  %v1557_v63 = vld [vmem:[%s4274_s7 + $0x730] sm:$0xff]  ;;  %v1539_v46 = vld [vmem:[%s4274_s7 + $0x6a0] sm:$0xff] }
 0x56f   :  { %2477 = vmatprep.subr.mxu1 %v1473_v5  ;;  %2510 = vmatprep.subr.mxu0 %v1506_v6  ;;  %v1572_v5 = vld [vmem:[%s4274_s7 + $0x7a8] sm:$0xff]  ;;  %v1523_v6 = vld [vmem:[%s4274_s7 + $0x620] sm:$0xff] }
 0x570   :  { %2478 = vmatpush3.msra.mxu1 %v1457_v0  ;;  %2511 = vmatpush3.msra.mxu0 %v1490_v1  ;;  %v1556_v0 = vld [vmem:[%s4274_s7 + $0x728] sm:$0xff]  ;;  %v1538_v1 = vld [vmem:[%s4274_s7 + $0x698] sm:$0xff] }
 0x571   :  { %2479 = vmatprep.subr.mxu1 %v1472_v30  ;;  %2512 = vmatprep.subr.mxu0 %v1505_v2  ;;  %v1571_v30 = vld [vmem:[%s4274_s7 + $0x7a0] sm:$0xff]  ;;  %v1522_v2 = vld [vmem:[%s4274_s7 + $0x618] sm:$0xff] }
 0x572   :  { %2480 = vmatpush3.msra.mxu1 %v1456_v3  ;;  %2513 = vmatpush3.msra.mxu0 %v1489_v8  ;;  %v1555_v3 = vld [vmem:[%s4274_s7 + $0x720] sm:$0xff]  ;;  %v1537_v8 = vld [vmem:[%s4274_s7 + $0x690] sm:$0xff] }
 0x573   :  { %2481 = vmatprep.subr.mxu1 %v1471_v10  ;;  %2514 = vmatprep.subr.mxu0 %v1504_v11  ;;  %v1570_v10 = vld [vmem:[%s4274_s7 + $0x798] sm:$0xff]  ;;  %v1521_v11 = vld [vmem:[%s4274_s7 + $0x610] sm:$0xff] }
 0x574   :  { %2482 = vmatpush3.msra.mxu1 %v1455_v12  ;;  %2515 = vmatpush3.msra.mxu0 %v1488_v14  ;;  %v1554_v12 = vld [vmem:[%s4274_s7 + $0x718] sm:$0xff]  ;;  %v1536_v14 = vld [vmem:[%s4274_s7 + $0x688] sm:$0xff] }
 0x575   :  { %1935 = vmatmul.mubr.f32.vlgmr.msra.gmra.mxu1 %v1283_v21  ;;  %2516 = vmatprep.subr.mxu0 %v1503_v15  ;;  %v1569_v15 = vld [vmem:[%s4274_s7 + $0x790] sm:$0xff]  ;;  %v1287_v21 = vld [vmem:[#allocation3 + $0x10] sm:$0x30] }
 0x576   :  { %2521 = vmatprep.subr.mxu1 %v1550_v17  ;;  %2517 = vmatpush3.msra.mxu0 %v1487_v18  ;;  %v1553_v17 = vld [vmem:[%s4274_s7 + $0x710] sm:$0xff]  ;;  %v1535_v18 = vld [vmem:[%s4274_s7 + $0x680] sm:$0xff] }
 0x577   :  { %2522 = vmatpush3.msra.mxu1 %v1534_v22  ;;  %2074 = vmatprep.mubr.f32.mxu1 %v1318_v23  ;;  %v1519_v22 = vld [vmem:[%s4274_s7 + $0x600] sm:$0xff]  ;;  %v1552_v23 = vld [vmem:[%s4274_s7 + $0x708] sm:$0xff] }
 0x578   :  { %2005 = vmatmul.mubr.f32.vlgmr.msra.gmra.mxu0 %v1311_v26  ;;  %2523 = vmatprep.subr.mxu1 %v1549_v24  ;;  %v1567_v24 = vld [vmem:[%s4274_s7 + $0x780] sm:$0xff]  ;;  %v1317_v26 = vrot.slane %v1287_v21, 4 }
 0x579   :  { %2556 = vmatprep.subr.mxu0 %v1582_v27  ;;  %2524 = vmatpush3.msra.mxu1 %v1533_v28  ;;  %v1551_v27 = vld [vmem:[%s4274_s7 + $0x700] sm:$0xff]  ;;  %v1323_v28 = vrot.slane %v1289_v25, 6  ;;  %s2620_s7 = smov [#allocation4]  }
 0x57a   :  { %2557 = vmatpush3.msra.mxu0 %v1566_v29  ;;  %2144 = vmatprep.mubr.f32.mxu0 %v1324_v31 }
 0x57b   :  { %2525 = vmatprep.subr.mxu1 %v1548_v32  ;;  %2558 = vmatprep.subr.mxu0 %v1581_v33 }
 0x57c   :  { %2526 = vmatpush3.msra.mxu1 %v1532_v34  ;;  %2559 = vmatpush3.msra.mxu0 %v1565_v35  ;;  %v2170_v35 = vld [vmem:[%s4275_s8] ss:$0 sm:$0xff]  ;;  %s2158_s8 = sshll.u32 %s2620_s7, 4  ;;  %s2159_s8 = int_to_ptr.vmem [resolvable:$true] %s2158_s8 }
 0x57d   :  { %2527 = vmatprep.subr.mxu1 %v1547_v36  ;;  %2560 = vmatprep.subr.mxu0 %v1580_v37  ;;  %s2597_s10 = scalar_lea.vmem %s2159_s8, 32  ;;  %p2602_p1 = scmp.lt.s32.totalorder %s2159_s8, %s2159_s8 }
 0x57e   :  { %2528 = vmatpush3.msra.mxu1 %v1531_v38  ;;  %2561 = vmatpush3.msra.mxu0 %v1564_v40  ;;  %p2598_p0 = scmp.ne.s32.totalorder %s2159_s8, %s2597_s10  ;;  %p2603_p2 = scmp.lt.s32.totalorder %s2597_s10, %s2597_s10 }
 0x57f   :  { %2529 = vmatprep.subr.mxu1 %v1546_v39  ;;  %2562 = vmatprep.subr.mxu0 %v1579_v41 }
 0x580   :  { %2530 = vmatpush3.msra.mxu1 %v1530_v4  ;;  %2563 = vmatpush3.msra.mxu0 %v1563_v42  ;;  %p2604_p3 = por %p2603_p2, %p2602_p1 }
 0x581   :  { %2531 = vmatprep.subr.mxu1 %v1545_v43  ;;  %2564 = vmatprep.subr.mxu0 %v1578_v44 }
 0x582   :  { %2532 = vmatpush3.msra.mxu1 %v1529_v47  ;;  %2565 = vmatpush3.msra.mxu0 %v1562_v48  ;;  %p2605_p4 = pnand %p2604_p3, %p2598_p0 }
 0x583   :  { %2533 = vmatprep.subr.mxu1 %v1544_v7  ;;  %2566 = vmatprep.subr.mxu0 %v1577_v49 }
 0x584   :  { %2534 = vmatpush3.msra.mxu1 %v1528_v13  ;;  %2567 = vmatpush3.msra.mxu0 %v1561_v50 }
 0x585   :  { %2535 = vmatprep.subr.mxu1 %v1543_v51  ;;  %2568 = vmatprep.subr.mxu0 %v1576_v52 }
 0x586   :  { %2536 = vmatpush3.msra.mxu1 %v1527_v9  ;;  %2569 = vmatpush3.msra.mxu0 %v1560_v20 }
 0x587   :  { %2537 = vmatprep.subr.mxu1 %v1542_v53  ;;  %2570 = vmatprep.subr.mxu0 %v1575_v54 }
 0x588   :  { %2538 = vmatpush3.msra.mxu1 %v1526_v55  ;;  %2571 = vmatpush3.msra.mxu0 %v1559_v56 }
 0x589   :  { %2539 = vmatprep.subr.mxu1 %v1541_v57  ;;  %2572 = vmatprep.subr.mxu0 %v1574_v58 }
 0x58a   :  { %2540 = vmatpush3.msra.mxu1 %v1525_v59  ;;  %2573 = vmatpush3.msra.mxu0 %v1558_v60 }
 0x58b   :  { %2541 = vmatprep.subr.mxu1 %v1540_v61  ;;  %2574 = vmatprep.subr.mxu0 %v1573_v62 }
 0x58c   :  { %2542 = vmatpush3.msra.mxu1 %v1524_v45  ;;  %2575 = vmatpush3.msra.mxu0 %v1557_v63 }
 0x58d   :  { %2543 = vmatprep.subr.mxu1 %v1539_v46  ;;  %2576 = vmatprep.subr.mxu0 %v1572_v5 }
 0x58e   :  { %2544 = vmatpush3.msra.mxu1 %v1523_v6  ;;  %2577 = vmatpush3.msra.mxu0 %v1556_v0 }
 0x58f   :  { %2545 = vmatprep.subr.mxu1 %v1538_v1  ;;  %2578 = vmatprep.subr.mxu0 %v1571_v30 }
 0x590   :  { %2546 = vmatpush3.msra.mxu1 %v1522_v2  ;;  %2579 = vmatpush3.msra.mxu0 %v1555_v3 }
 0x591   :  { %2547 = vmatprep.subr.mxu1 %v1537_v8  ;;  %2580 = vmatprep.subr.mxu0 %v1570_v10 }
 0x592   :  { %2548 = vmatpush3.msra.mxu1 %v1521_v11  ;;  %2581 = vmatpush3.msra.mxu0 %v1554_v12 }
 0x593   :  { %2549 = vmatprep.subr.mxu1 %v1536_v14  ;;  %2582 = vmatprep.subr.mxu0 %v1569_v15 }
 0x594   :  { %2550 = vmatpush3.msra.mxu1 %v1520_v16  ;;  %2583 = vmatpush3.msra.mxu0 %v1553_v17 }
 0x595   :  { %2551 = vmatprep.subr.mxu1 %v1535_v18  ;;  %2584 = vmatprep.subr.mxu0 %v1568_v19 }
 0x596   :  { %2552 = vmatpush3.msra.mxu1 %v1519_v22  ;;  %2585 = vmatpush3.msra.mxu0 %v1552_v23 }
 0x597   :  { %2075 = vmatmul.mubr.f32.vlgmr.msra.gmra.mxu1 %v1317_v26  ;;  %2586 = vmatprep.subr.mxu0 %v1567_v24 }
 0x598   :  { %2587 = vmatpush3.msra.mxu0 %v1551_v27 }
 0x599   :  { %2145 = vmatmul.mubr.f32.vlgmr.msra.gmra.mxu0 %v1323_v28 }
 0x5f2   :  { %v2343_v29 = vpop.f32.mrf.mxu1 }
 0x5f4   :  { %v2344_v31 = vpop.f32.mrf.mxu1 }
 0x5f5   :  { %v2378_v32 = vpop.f32.mrf.mxu0  ;;  %v2345_v34 = vadd.f32 %v2344_v31, %v2343_v29 }
 0x5f7   :  { %v2379_v36 = vpop.f32.mrf.mxu0  ;;  %v1657_v40 = vadd.f32 %v2345_v34, %v2170_v35 }
 0x5f8   :  { %v2380_v39 = vadd.f32 %v2379_v36, %v2378_v32 }
 0x5fa   :  { %v1727_v43 = vadd.f32 %v2380_v39, %v1657_v40 }
 0x613   :  { %v2413_v33 = vpop.f32.mrf.mxu1 }
 0x615   :  { %v2414_v37 = vpop.f32.mrf.mxu1 }
 0x616   :  { %v2448_v38 = vpop.f32.mrf.mxu0  ;;  %v2415_v4 = vadd.f32 %v2414_v37, %v2413_v33 }
 0x618   :  { %v2449_v42 = vpop.f32.mrf.mxu0  ;;  %v1797_v48 = vadd.f32 %v2415_v4, %v1727_v43 }
 0x619   :  { %v2450_v7 = vadd.f32 %v2449_v42, %v2448_v38 }
 0x61b   :  { %v1867_v50 = vadd.f32 %v2450_v7, %v1797_v48 }
 0x635   :  { %v2483_v41 = vpop.f32.mrf.mxu1 }
 0x637   :  { %v2484_v44 = vpop.f32.mrf.mxu1 }
 0x638   :  { %v2518_v47 = vpop.f32.mrf.mxu0  ;;  %v2485_v49 = vadd.f32 %v2484_v44, %v2483_v41 }
 0x63a   :  { %v2519_v13 = vpop.f32.mrf.mxu0  ;;  %v1937_v51 = vadd.f32 %v2485_v49, %v1867_v50 }
 0x63b   :  { %v2520_v52 = vadd.f32 %v2519_v13, %v2518_v47 }
 0x63d   :  { %v2007_v54 = vadd.f32 %v2520_v52, %v1937_v51 }
 0x657   :  { %v2553_v9 = vpop.f32.mrf.mxu1 }
 0x659   :  { %v2554_v20 = vpop.f32.mrf.mxu1  ;;  %v2588_v53 = vpop.f32.mrf.mxu0 }
 0x65a   :  { %v2555_v55 = vadd.f32 %v2554_v20, %v2553_v9 }
 0x65b   :  { %v2589_v56 = vpop.f32.mrf.mxu0 }
 0x65c   :  { %v2077_v57 = vadd.f32 %v2555_v55, %v2007_v54  ;;  %v2590_v58 = vadd.f32 %v2589_v56, %v2588_v53 }
 0x65e   :  { %v2147_v59 = vadd.f32 %v2590_v58, %v2077_v57 }
 0x660   :  { %2151 = vst.msk [vmem:[#allocation4] sm:$0x3] %vm2150_vm4, %v2147_v59 }
 0x661   :  { %2608 = shalt.err (!%p2605_p4)
}
 0x662   :  { %2161 = dma.vmem_to_hbm [thread:$0]  %s2159_s8, 32, %s4276_s9, [#allocation5]  }
 0x663   :  { %2617 = dma.done.wait [#allocation5], 32  }
 0x664   :  { %2618 = vsyncadd [#allocation5], 4294967264 }
 0x665   :  { %2165 = vsyncpa [#allocation5], 1 }

</bundles_post_ra>
